<compile_context>
chip_gen: v7x
topology: tpu7x:2x2x1
jax: 0.10.0
libtpu: 0.0.40
codegen_flags: <defaults>
</compile_context>

<pallas_src>
import functools
import math

import jax
import jax.numpy as jnp
from jax.experimental import pallas as pl
from jax.experimental.pallas import tpu as pltpu


# ----------------------------- config ---------------------------------------
class GPT2Config:
    vocab_size = 128
    hidden_size = 64           # n_embd
    num_attention_heads = 4
    num_hidden_layers = 2
    max_position_embeddings = 16
    n_inner = None             # -> 4 * hidden_size
    layer_norm_epsilon = 1e-5
    scale_attn_weights = True
    scale_attn_by_inverse_layer_idx = False
    activation_function = "gelu_new"
    resid_pdrop = 0.0          # inference / eval: dropout is identity


# ----------------------------- helpers ---------------------------------------
_M_TILES = (512, 256, 128, 64, 32, 16, 8)   # sublane-axis tiles
_N_TILES = (256, 128)                       # lane-axis tiles (mult of 128)
_K_TILES = (1024, 512, 256, 128)            # contraction tiles
_VMEM_LIMIT = 32 * 1024 * 1024              # explicit scoped-VMEM cap (v7x-safe)
_MASK_VALUE = float(jnp.finfo(jnp.float32).min)   # matches torch.finfo(fp32).min


def _round_up(x, m):
    return ((x + m - 1) // m) * m


def _pick_tile(dim, candidates):
    """Largest candidate tile that evenly divides `dim`, else the full dim."""
    for c in candidates:
        if c <= dim and dim % c == 0:
            return c
    return dim


def _pick_lane_tile(n, candidates=_N_TILES):
    """Lane-axis tile: multiple of 128 that divides n, or full dim if small."""
    for c in candidates:
        if c <= n and n % c == 0:
            return c
    if n <= 512:
        return n            # small lane dim: one (possibly masked) tile
    raise ValueError(f"lane dim {n} should be padded to a multiple of 128")


def _pick_m_tile(m, k, itemsize=2, budget_bytes=8 << 20):
    """Prefer a single M tile so the (K, N) weight streams from HBM once."""
    if m * k * (2 * itemsize + itemsize) <= budget_bytes:   # 2 x bufs + LN scratch
        return m
    return _pick_tile(m, _M_TILES)


def _gelu_new(y):
    # GPT-2 "new" GELU (tanh approximation), computed in fp32.
    return 0.5 * y * (1.0 + jnp.tanh(0.7978845608028654 * (y + 0.044715 * (y * y * y))))


# ----------------------------- Pallas kernels --------------------------------
def _ln_linear_kernel(x_ref, g_ref, b_ref, w_ref, *rest, eps, activation):
    """Fused LayerNorm + Conv1D/Linear (+ optional GELU), optional bias.

    LayerNorm runs once per M tile (at j == 0) into a bf16 VMEM scratch; the
    MXU consumes the scratch for every weight tile j.
    """
    if len(rest) == 3:
        bias_ref, o_ref, xn_ref = rest
    else:
        bias_ref = None
        o_ref, xn_ref = rest

    @pl.when(pl.program_id(1) == 0)
    def _():
        x = x_ref[...].astype(jnp.float32)                    # (tm, K) fp32 stats
        mean = jnp.mean(x, axis=-1, keepdims=True)
        var = jnp.mean(jnp.square(x - mean), axis=-1, keepdims=True)
        xn = (x - mean) * jax.lax.rsqrt(var + eps)
        xn = xn * g_ref[...].astype(jnp.float32) + b_ref[...].astype(jnp.float32)
        xn_ref[...] = xn.astype(xn_ref.dtype)                 # bf16 for the MXU

    y = jnp.dot(xn_ref[...], w_ref[...], preferred_element_type=jnp.float32)
    if bias_ref is not None:
        y = y + bias_ref[...].astype(jnp.float32)
    if activation == "gelu_new":
        y = _gelu_new(y)
    o_ref[...] = y.astype(o_ref.dtype)


def _linear_residual_kernel(x_ref, w_ref, bias_ref, res_ref, o_ref, acc_ref):
    """Tiled matmul with K grid axis, fp32 accumulator and fused residual add."""
    @pl.when(pl.program_id(2) == 0)
    def _():
        acc_ref[...] = jnp.zeros_like(acc_ref)

    acc_ref[...] += jnp.dot(x_ref[...], w_ref[...],
                            preferred_element_type=jnp.float32)

    @pl.when(pl.program_id(2) == pl.num_programs(2) - 1)
    def _():
        y = (acc_ref[...] + bias_ref[...].astype(jnp.float32)
             + res_ref[...].astype(jnp.float32))
        o_ref[...] = y.astype(o_ref.dtype)


def _attention_kernel(qkv_ref, o_ref, k_out_ref, v_out_ref, *,
                      num_heads, head_dim, mask_value):
    """Causal softmax attention for all heads of one batch element.

    qkv_ref: (S, 3E) slab straight out of c_attn (q already pre-scaled at init).
    Writes merged-head output (S, E) and the KV cache slices (1, H, S, D).
    """
    S = qkv_ref.shape[0]
    E = num_heads * head_dim
    qkv = qkv_ref[...]

    row = jax.lax.broadcasted_iota(jnp.int32, (S, S), 0)
    col = jax.lax.broadcasted_iota(jnp.int32, (S, S), 1)
    causal = col <= row                                  # past_length = 0

    outs = []
    for h in range(num_heads):                           # static unroll over heads
        lo = h * head_dim
        hi = lo + head_dim
        q_h = qkv[:, lo:hi]                              # (S, D) bf16 (pre-scaled)
        k_h = qkv[:, E + lo:E + hi]
        v_h = qkv[:, 2 * E + lo:2 * E + hi]

        s = jnp.dot(q_h, k_h.T, preferred_element_type=jnp.float32)   # (S, S) fp32
        s = jnp.where(causal, s, mask_value)
        s = s - jnp.max(s, axis=-1, keepdims=True)
        p = jnp.exp(s)
        p = p * pl.reciprocal(jnp.sum(p, axis=-1, keepdims=True), approx=True)
        o_h = jnp.dot(p.astype(v_h.dtype), v_h,
                      preferred_element_type=jnp.float32)               # (S, D)
        outs.append(o_h.astype(o_ref.dtype))

        k_out_ref[0, h, :, :] = k_h                      # KV cache in (B,H,S,D)
        v_out_ref[0, h, :, :] = v_h

    o_ref[...] = jnp.concatenate(outs, axis=-1)          # merged (S, E) layout


# ----------------------------- wrappers --------------------------------------
def pallas_ln_linear(x, gamma, beta, w, bias, eps, activation=None, out_dtype=None):
    """LayerNorm(x) @ w (+ bias) (+ GELU).  x:(M,K), w:(K,N)."""
    M, K = x.shape
    N = w.shape[1]
    out_dtype = x.dtype if out_dtype is None else out_dtype
    tm = _pick_m_tile(M, K, x.dtype.itemsize)
    tn = _pick_lane_tile(N)
    grid = (M // tm, N // tn)

    in_specs = [
        pl.BlockSpec((tm, K), lambda i, j: (i, 0)),
        pl.BlockSpec((1, K), lambda i, j: (0, 0)),
        pl.BlockSpec((1, K), lambda i, j: (0, 0)),
        pl.BlockSpec((K, tn), lambda i, j: (0, j)),
    ]
    operands = [x, gamma.reshape(1, K), beta.reshape(1, K), w]
    if bias is not None:
        in_specs.append(pl.BlockSpec((1, tn), lambda i, j: (0, j)))
        operands.append(bias.reshape(1, N))

    return pl.pallas_call(
        functools.partial(_ln_linear_kernel, eps=eps, activation=activation),
        out_shape=jax.ShapeDtypeStruct((M, N), out_dtype),
        grid=grid,
        in_specs=in_specs,
        out_specs=pl.BlockSpec((tm, tn), lambda i, j: (i, j)),
        scratch_shapes=[pltpu.VMEM((tm, K), w.dtype)],     # cached LN activation
        compiler_params=pltpu.CompilerParams(
            dimension_semantics=("parallel", "arbitrary"),
            vmem_limit_bytes=_VMEM_LIMIT),
    )(*operands)


def pallas_linear_residual(x, w, bias, residual, out_dtype=None):
    """residual + (x @ w + bias), tiled over M/N/K with an fp32 accumulator."""
    M, K = x.shape
    N = w.shape[1]
    out_dtype = residual.dtype if out_dtype is None else out_dtype
    tm = _pick_m_tile(M, K, x.dtype.itemsize)
    tn = _pick_lane_tile(N)
    tk = _pick_tile(K, _K_TILES)
    grid = (M // tm, N // tn, K // tk)

    return pl.pallas_call(
        _linear_residual_kernel,
        out_shape=jax.ShapeDtypeStruct((M, N), out_dtype),
        grid=grid,
        in_specs=[
            pl.BlockSpec((tm, tk), lambda i, j, k: (i, k)),
            pl.BlockSpec((tk, tn), lambda i, j, k: (k, j)),
            pl.BlockSpec((1, tn), lambda i, j, k: (0, j)),
            pl.BlockSpec((tm, tn), lambda i, j, k: (i, j)),
        ],
        out_specs=pl.BlockSpec((tm, tn), lambda i, j, k: (i, j)),
        scratch_shapes=[pltpu.VMEM((tm, tn), jnp.float32)],
        compiler_params=pltpu.CompilerParams(
            dimension_semantics=("parallel", "parallel", "arbitrary"),
            vmem_limit_bytes=_VMEM_LIMIT),
    )(x, w, bias.reshape(1, N), residual)


def pallas_attention(qkv, B, S, H, D):
    """qkv: (B*S, 3E) from c_attn.  Returns (attn_out (B*S, E), k, v (B,H,S,D))."""
    E = H * D
    kernel = functools.partial(_attention_kernel, num_heads=H, head_dim=D,
                               mask_value=_MASK_VALUE)
    out_shape = (jax.ShapeDtypeStruct((B * S, E), qkv.dtype),
                 jax.ShapeDtypeStruct((B, H, S, D), qkv.dtype),
                 jax.ShapeDtypeStruct((B, H, S, D), qkv.dtype))
    out_specs = (pl.BlockSpec((S, E), lambda b: (b, 0)),
                 pl.BlockSpec((1, H, S, D), lambda b: (b, 0, 0, 0)),
                 pl.BlockSpec((1, H, S, D), lambda b: (b, 0, 0, 0)))
    attn_out, k_cache, v_cache = pl.pallas_call(
        kernel,
        out_shape=out_shape,
        grid=(B,),
        in_specs=[pl.BlockSpec((S, 3 * E), lambda b: (b, 0))],
        out_specs=out_specs,
        compiler_params=pltpu.CompilerParams(
            dimension_semantics=("parallel",),
            vmem_limit_bytes=_VMEM_LIMIT),
    )(qkv)
    return attn_out, k_cache, v_cache


# ----------------------------- parameters ------------------------------------
def init_params(cfg, key):
    E = cfg.hidden_size
    H = cfg.num_attention_heads
    D = E // H
    inner = cfg.n_inner if cfg.n_inner is not None else 4 * E
    V = cfg.vocab_size
    Vp = _round_up(V, 128)          # pad vocab lane dim to a multiple of 128
    P = cfg.max_position_embeddings
    wdt = jnp.bfloat16              # bf16 weights/embeddings for the MXU

    def normal(key, shape, std=0.02):
        return std * jax.random.normal(key, shape, dtype=jnp.float32)

    keys = iter(jax.random.split(key, 64))

    # nn.Linear(E, V, bias=False) weight is (V, E); store it pre-transposed and
    # padded ONCE as (E, Vp) so the forward never re-transposes/pads the vocab.
    lm_w = normal(next(keys), (V, E))
    lm_wt = jnp.zeros((E, Vp), jnp.float32).at[:, :V].set(lm_w.T)

    params = {
        "wte": normal(next(keys), (V, E)).astype(wdt),
        "wpe": normal(next(keys), (P, E)).astype(wdt),
        "lnf_g": jnp.ones((E,), jnp.float32),
        "lnf_b": jnp.zeros((E,), jnp.float32),
        "lm_head_wt": lm_wt.astype(wdt),
        "layers": [],
    }
    for layer_idx in range(cfg.num_hidden_layers):
        # Fold the softmax scale into the q slice of c_attn (free at init).
        scale = (1.0 / math.sqrt(D)) if cfg.scale_attn_weights else 1.0
        if cfg.scale_attn_by_inverse_layer_idx:
            scale = scale / float(layer_idx + 1)
        c_attn_w = normal(next(keys), (E, 3 * E))          # Conv1D weight (nx, nf)
        c_attn_w = c_attn_w.at[:, :E].multiply(scale)
        c_attn_b = jnp.zeros((3 * E,), jnp.float32).at[:E].multiply(scale)

        layer = {
            "ln1_g": jnp.ones((E,), jnp.float32),
            "ln1_b": jnp.zeros((E,), jnp.float32),
            "c_attn_w": c_attn_w.astype(wdt),
            "c_attn_b": c_attn_b,
            "c_proj_w": normal(next(keys), (E, E)).astype(wdt),
            "c_proj_b": jnp.zeros((E,), jnp.float32),
            "ln2_g": jnp.ones((E,), jnp.float32),
            "ln2_b": jnp.zeros((E,), jnp.float32),
            "c_fc_w": normal(next(keys), (E, inner)).astype(wdt),
            "c_fc_b": jnp.zeros((inner,), jnp.float32),
            "c_mproj_w": normal(next(keys), (inner, E)).astype(wdt),
            "c_mproj_b": jnp.zeros((E,), jnp.float32),
        }
        params["layers"].append(layer)
    return params


# ----------------------------- forward pass -----------------------------------
def gpt2_lm_head_forward(params, cfg, input_ids):
    B, S = input_ids.shape
    E = cfg.hidden_size
    H = cfg.num_attention_heads
    D = E // H
    V = cfg.vocab_size
    eps = cfg.layer_norm_epsilon

    # Embedding gathers stay plain-JAX glue.
    position_ids = jnp.arange(0, S, dtype=jnp.int32)                    # (S,)
    inputs_embeds = jnp.take(params["wte"], input_ids, axis=0)          # (B, S, E)
    position_embeds = jnp.take(params["wpe"], position_ids, axis=0)     # (S, E)
    h = (inputs_embeds + position_embeds[None, :, :]).reshape(B * S, E)  # bf16

    presents = []
    for layer in params["layers"]:
        # --- attention block: ln_1 fused into c_attn, heads sliced in-kernel ---
        residual = h
        qkv = pallas_ln_linear(h, layer["ln1_g"], layer["ln1_b"],
                               layer["c_attn_w"], layer["c_attn_b"], eps)  # (B*S, 3E)
        attn_out, k_cache, v_cache = pallas_attention(qkv, B, S, H, D)
        presents.append((k_cache, v_cache))                               # cache_kv
        # c_proj with the residual add fused into the finalize store.
        h = pallas_linear_residual(attn_out, layer["c_proj_w"],
                                   layer["c_proj_b"], residual)           # (B*S, E)

        # --- MLP block: ln_2 + GELU fused into c_fc; residual fused into proj ---
        residual = h
        x = pallas_ln_linear(h, layer["ln2_g"], layer["ln2_b"],
                             layer["c_fc_w"], layer["c_fc_b"], eps,
                             activation="gelu_new")                       # (B*S, 4E)
        # TODO(synk): resid_pdrop dropout omitted (eval/inference -> identity)
        h = pallas_linear_residual(x, layer["c_mproj_w"],
                                   layer["c_mproj_b"], residual)          # (B*S, E)

    # ln_f fused into lm_head; weight pre-transposed & vocab-padded at init.
    logits = pallas_ln_linear(h, params["lnf_g"], params["lnf_b"],
                              params["lm_head_wt"], None, eps,
                              out_dtype=jnp.float32)                      # (B*S, Vp)
    if logits.shape[1] != V:
        logits = logits[:, :V]
    logits = logits.reshape(B, S, V)
    return logits, tuple(presents)


# ----------------------------- main -------------------------------------------
if __name__ == "__main__":
    cfg = GPT2Config()
    key = jax.random.PRNGKey(0)
    pkey, ikey = jax.random.split(key)
    params = init_params(cfg, pkey)

    batch, seq = 2, 8
    input_ids = jax.random.randint(ikey, (batch, seq), 0, cfg.vocab_size,
                                   dtype=jnp.int32)

    fwd = jax.jit(lambda p, ids: gpt2_lm_head_forward(p, cfg, ids))
    logits, presents = fwd(params, input_ids)
    jax.block_until_ready(logits)
    for (kc, vc) in presents:
        jax.block_until_ready(kc)
        jax.block_until_ready(vc)

    assert logits.shape == (batch, seq, cfg.vocab_size)
    assert logits.dtype == jnp.float32
    assert bool(jnp.all(jnp.isfinite(logits)))
    assert len(presents) == cfg.num_hidden_layers
    assert presents[0][0].shape == (batch, cfg.num_attention_heads, seq,
                                    cfg.hidden_size // cfg.num_attention_heads)
    print("KERNEL_OK")
</pallas_src>

<mosaic_0001>
module attributes {stable_mosaic.version = 11 : i64} {
  func.func @_ln_linear_kernel(%arg0: i32, %arg1: i32, %arg2: memref<16x64xbf16, #tpu.memory_space<vmem>>, %arg3: memref<1x64xf32, #tpu.memory_space<vmem>>, %arg4: memref<1x64xf32, #tpu.memory_space<vmem>>, %arg5: memref<64x192xbf16, #tpu.memory_space<vmem>>, %arg6: memref<1x192xf32, #tpu.memory_space<vmem>>, %arg7: memref<16x192xbf16, #tpu.memory_space<vmem>>, %arg8: memref<16x64xbf16, #tpu.memory_space<vmem>>) attributes {dimension_semantics = [#tpu.dimension_semantics<parallel>, #tpu.dimension_semantics<arbitrary>], iteration_bounds = array<i64: 1, 1>, scalar_prefetch = 0 : i64, scratch_operands = 1 : i64, tpu.core_type = #tpu.core_type<tc>, window_params = [{transform_indices = @transform_0, window_bounds = array<i64: 16, 64>}, {pipeline_mode = #tpu.pipeline_mode<synchronous>, transform_indices = @transform_1, window_bounds = array<i64: 1, 64>}, {pipeline_mode = #tpu.pipeline_mode<synchronous>, transform_indices = @transform_2, window_bounds = array<i64: 1, 64>}, {transform_indices = @transform_3, window_bounds = array<i64: 64, 192>}, {transform_indices = @transform_4, window_bounds = array<i64: 1, 192>}, {transform_indices = @transform_5, window_bounds = array<i64: 16, 192>}]} {
    %c0_i32 = arith.constant 0 : i32
    %0 = arith.cmpi eq, %arg1, %c0_i32 : i32
    %1 = arith.extui %0 : i1 to i32
    %c0_i32_0 = arith.constant 0 : i32
    %2 = arith.cmpi ne, %1, %c0_i32_0 : i32
    scf.if %2 {
      %c0_8 = arith.constant 0 : index
      %c0_9 = arith.constant 0 : index
      %11 = vector.load %arg2[%c0_8, %c0_9] : memref<16x64xbf16, #tpu.memory_space<vmem>>, vector<16x64xbf16>
      %12 = arith.extf %11 : vector<16x64xbf16> to vector<16x64xf32>
      %cst_10 = arith.constant dense<0.000000e+00> : vector<16xf32>
      %13 = vector.multi_reduction <add>, %12, %cst_10 [1] : vector<16x64xf32> to vector<16xf32>
      %14 = vector.shape_cast %13 : vector<16xf32> to vector<16x1xf32>
      %cst_11 = arith.constant 6.400000e+01 : f32
      %15 = vector.broadcast %cst_11 : f32 to vector<16x1xf32>
      %16 = arith.divf %14, %15 : vector<16x1xf32>
      %17 = vector.broadcast %16 : vector<16x1xf32> to vector<16x64xf32>
      %18 = arith.subf %12, %17 : vector<16x64xf32>
      %19 = arith.mulf %18, %18 : vector<16x64xf32>
      %cst_12 = arith.constant dense<0.000000e+00> : vector<16xf32>
      %20 = vector.multi_reduction <add>, %19, %cst_12 [1] : vector<16x64xf32> to vector<16xf32>
      %21 = vector.shape_cast %20 : vector<16xf32> to vector<16x1xf32>
      %cst_13 = arith.constant 6.400000e+01 : f32
      %22 = vector.broadcast %cst_13 : f32 to vector<16x1xf32>
      %23 = arith.divf %21, %22 : vector<16x1xf32>
      %24 = vector.broadcast %16 : vector<16x1xf32> to vector<16x64xf32>
      %25 = arith.subf %12, %24 : vector<16x64xf32>
      %cst_14 = arith.constant 9.99999974E-6 : f32
      %26 = vector.broadcast %cst_14 : f32 to vector<16x1xf32>
      %27 = arith.addf %23, %26 : vector<16x1xf32>
      %28 = math.rsqrt %27 : vector<16x1xf32>
      %29 = vector.broadcast %28 : vector<16x1xf32> to vector<16x64xf32>
      %30 = arith.mulf %25, %29 : vector<16x64xf32>
      %c0_15 = arith.constant 0 : index
      %c0_16 = arith.constant 0 : index
      %31 = vector.load %arg3[%c0_15, %c0_16] : memref<1x64xf32, #tpu.memory_space<vmem>>, vector<1x64xf32>
      %32 = vector.broadcast %31 : vector<1x64xf32> to vector<16x64xf32>
      %33 = arith.mulf %30, %32 : vector<16x64xf32>
      %c0_17 = arith.constant 0 : index
      %c0_18 = arith.constant 0 : index
      %34 = vector.load %arg4[%c0_17, %c0_18] : memref<1x64xf32, #tpu.memory_space<vmem>>, vector<1x64xf32>
      %35 = vector.broadcast %34 : vector<1x64xf32> to vector<16x64xf32>
      %36 = arith.addf %33, %35 : vector<16x64xf32>
      %37 = arith.truncf %36 : vector<16x64xf32> to vector<16x64xbf16>
      %c0_19 = arith.constant 0 : index
      %c0_20 = arith.constant 0 : index
      %38 = vector.load %arg8[%c0_19, %c0_20] : memref<16x64xbf16, #tpu.memory_space<vmem>>, vector<16x64xbf16>
      tpu.vector_store %arg8[%c0_19, %c0_20], %37 {strides = array<i32>} : memref<16x64xbf16, #tpu.memory_space<vmem>>, vector<16x64xbf16>,
    } else {
    }
    %c0 = arith.constant 0 : index
    %c0_1 = arith.constant 0 : index
    %3 = vector.load %arg8[%c0, %c0_1] : memref<16x64xbf16, #tpu.memory_space<vmem>>, vector<16x64xbf16>
    %c0_2 = arith.constant 0 : index
    %c0_3 = arith.constant 0 : index
    %4 = vector.load %arg5[%c0_2, %c0_3] : memref<64x192xbf16, #tpu.memory_space<vmem>>, vector<64x192xbf16>
    %cst = arith.constant dense<0.000000e+00> : vector<16x192xf32>
    %5 = tpu.matmul %3, %4, %cst {dimension_numbers = #tpu.dot_dimension_numbers<[1], [0], [0], [1], [0, 0, 1, 1], [], []>} : vector<16x64xbf16>, vector<64x192xbf16>, vector<16x192xf32> -> vector<16x192xf32>
    %c0_4 = arith.constant 0 : index
    %c0_5 = arith.constant 0 : index
    %6 = vector.load %arg6[%c0_4, %c0_5] : memref<1x192xf32, #tpu.memory_space<vmem>>, vector<1x192xf32>
    %7 = vector.broadcast %6 : vector<1x192xf32> to vector<16x192xf32>
    %8 = arith.addf %5, %7 : vector<16x192xf32>
    %9 = arith.truncf %8 : vector<16x192xf32> to vector<16x192xbf16>
    %c0_6 = arith.constant 0 : index
    %c0_7 = arith.constant 0 : index
    %10 = vector.load %arg7[%c0_6, %c0_7] : memref<16x192xbf16, #tpu.memory_space<vmem>>, vector<16x192xbf16>
    tpu.vector_store %arg7[%c0_6, %c0_7], %9 {strides = array<i32>} : memref<16x192xbf16, #tpu.memory_space<vmem>>, vector<16x192xbf16>,
    return
  }
  func.func @transform_0(%arg0: i32, %arg1: i32) -> (i32, i32) {
    %c0_i32 = arith.constant 0 : i32
    %c0_i32_0 = arith.constant 0 : i32
    return %arg0, %c0_i32 : i32, i32
  }
  func.func @transform_1(%arg0: i32, %arg1: i32) -> (i32, i32) {
    %c0_i32 = arith.constant 0 : i32
    %c0_i32_0 = arith.constant 0 : i32
    %c0_i32_1 = arith.constant 0 : i32
    return %c0_i32, %c0_i32_0 : i32, i32
  }
  func.func @transform_2(%arg0: i32, %arg1: i32) -> (i32, i32) {
    %c0_i32 = arith.constant 0 : i32
    %c0_i32_0 = arith.constant 0 : i32
    %c0_i32_1 = arith.constant 0 : i32
    return %c0_i32, %c0_i32_0 : i32, i32
  }
  func.func @transform_3(%arg0: i32, %arg1: i32) -> (i32, i32) {
    %c0_i32 = arith.constant 0 : i32
    %c0_i32_0 = arith.constant 0 : i32
    return %c0_i32, %arg1 : i32, i32
  }
  func.func @transform_4(%arg0: i32, %arg1: i32) -> (i32, i32) {
    %c0_i32 = arith.constant 0 : i32
    %c0_i32_0 = arith.constant 0 : i32
    return %c0_i32, %arg1 : i32, i32
  }
  func.func @transform_5(%arg0: i32, %arg1: i32) -> (i32, i32) {
    %c0_i32 = arith.constant 0 : i32
    return %arg0, %arg1 : i32, i32
  }
}

module attributes {stable_mosaic.version = 11 : i64} {
  func.func @_attention_kernel(%arg0: i32, %arg1: memref<8x192xbf16, #tpu.memory_space<vmem>>, %arg2: memref<8x64xbf16, #tpu.memory_space<vmem>>, %arg3: memref<1x4x8x16xbf16, #tpu.memory_space<vmem>>, %arg4: memref<1x4x8x16xbf16, #tpu.memory_space<vmem>>) attributes {dimension_semantics = [#tpu.dimension_semantics<parallel>], iteration_bounds = array<i64: 2>, scalar_prefetch = 0 : i64, scratch_operands = 0 : i64, tpu.core_type = #tpu.core_type<tc>, window_params = [{transform_indices = @transform_0, window_bounds = array<i64: 8, 192>}, {transform_indices = @transform_1, window_bounds = array<i64: 8, 64>}, {transform_indices = @transform_2, window_bounds = array<i64: 1, 4, 8, 16>}, {transform_indices = @transform_3, window_bounds = array<i64: 1, 4, 8, 16>}]} {
    %c0 = arith.constant 0 : index
    %c0_0 = arith.constant 0 : index
    %0 = vector.load %arg1[%c0, %c0_0] : memref<8x192xbf16, #tpu.memory_space<vmem>>, vector<8x192xbf16>
    %1 = tpu.iota {dimensions = array<i32: 0>} : vector<8x8xi32>
    %2 = tpu.iota {dimensions = array<i32: 1>} : vector<8x8xi32>
    %3 = arith.cmpi sle, %2, %1 : vector<8x8xi32>
    %4 = vector.extract_strided_slice %0 {offsets = [0, 0], sizes = [8, 16], strides = [1, 1]} : vector<8x192xbf16> to vector<8x16xbf16>
    %5 = vector.extract_strided_slice %0 {offsets = [0, 64], sizes = [8, 16], strides = [1, 1]} : vector<8x192xbf16> to vector<8x16xbf16>
    %6 = vector.extract_strided_slice %0 {offsets = [0, 128], sizes = [8, 16], strides = [1, 1]} : vector<8x192xbf16> to vector<8x16xbf16>
    %7 = tpu.transpose %5, [1, 0] : vector<8x16xbf16> -> vector<16x8xbf16>
    %cst = arith.constant dense<0.000000e+00> : vector<8x8xf32>
    %8 = tpu.matmul %4, %7, %cst {dimension_numbers = #tpu.dot_dimension_numbers<[1], [0], [0], [1], [0, 0, 1, 1], [], []>} : vector<8x16xbf16>, vector<16x8xbf16>, vector<8x8xf32> -> vector<8x8xf32>
    %cst_1 = arith.constant -3.40282347E+38 : f32
    %9 = vector.broadcast %cst_1 : f32 to vector<8x8xf32>
    %10 = arith.select %3, %8, %9 : vector<8x8xi1>, vector<8x8xf32>
    %cst_2 = arith.constant dense<0xFF800000> : vector<8xf32>
    %11 = vector.multi_reduction <maximumf>, %10, %cst_2 [1] : vector<8x8xf32> to vector<8xf32>
    %12 = vector.shape_cast %11 : vector<8xf32> to vector<8x1xf32>
    %13 = vector.broadcast %12 : vector<8x1xf32> to vector<8x8xf32>
    %14 = arith.subf %10, %13 : vector<8x8xf32>
    %15 = math.exp %14 : vector<8x8xf32>
    %cst_3 = arith.constant dense<0.000000e+00> : vector<8xf32>
    %16 = vector.multi_reduction <add>, %15, %cst_3 [1] : vector<8x8xf32> to vector<8xf32>
    %17 = vector.shape_cast %16 : vector<8xf32> to vector<8x1xf32>
    %18 = tpu.reciprocal %17 {approx = true} : vector<8x1xf32> -> vector<8x1xf32>
    %19 = vector.broadcast %18 : vector<8x1xf32> to vector<8x8xf32>
    %20 = arith.mulf %15, %19 : vector<8x8xf32>
    %21 = arith.truncf %20 : vector<8x8xf32> to vector<8x8xbf16>
    %cst_4 = arith.constant dense<0.000000e+00> : vector<8x16xf32>
    %22 = tpu.matmul %21, %6, %cst_4 {dimension_numbers = #tpu.dot_dimension_numbers<[1], [0], [0], [1], [0, 0, 1, 1], [], []>} : vector<8x8xbf16>, vector<8x16xbf16>, vector<8x16xf32> -> vector<8x16xf32>
    %23 = arith.truncf %22 : vector<8x16xf32> to vector<8x16xbf16>
    %c0_5 = arith.constant 0 : index
    %c0_6 = arith.constant 0 : index
    %c0_7 = arith.constant 0 : index
    %c0_8 = arith.constant 0 : index
    %24 = vector.load %arg3[%c0_5, %c0_6, %c0_7, %c0_8] : memref<1x4x8x16xbf16, #tpu.memory_space<vmem>>, vector<1x1x8x16xbf16>
    %25 = vector.shape_cast %24 : vector<1x1x8x16xbf16> to vector<8x16xbf16>
    %26 = vector.shape_cast %5 : vector<8x16xbf16> to vector<1x1x8x16xbf16>
    tpu.vector_store %arg3[%c0_5, %c0_6, %c0_7, %c0_8], %26 {strides = array<i32>} : memref<1x4x8x16xbf16, #tpu.memory_space<vmem>>, vector<1x1x8x16xbf16>,
    %c0_9 = arith.constant 0 : index
    %c0_10 = arith.constant 0 : index
    %c0_11 = arith.constant 0 : index
    %c0_12 = arith.constant 0 : index
    %27 = vector.load %arg4[%c0_9, %c0_10, %c0_11, %c0_12] : memref<1x4x8x16xbf16, #tpu.memory_space<vmem>>, vector<1x1x8x16xbf16>
    %28 = vector.shape_cast %27 : vector<1x1x8x16xbf16> to vector<8x16xbf16>
    %29 = vector.shape_cast %6 : vector<8x16xbf16> to vector<1x1x8x16xbf16>
    tpu.vector_store %arg4[%c0_9, %c0_10, %c0_11, %c0_12], %29 {strides = array<i32>} : memref<1x4x8x16xbf16, #tpu.memory_space<vmem>>, vector<1x1x8x16xbf16>,
    %30 = vector.extract_strided_slice %0 {offsets = [0, 16], sizes = [8, 16], strides = [1, 1]} : vector<8x192xbf16> to vector<8x16xbf16>
    %31 = vector.extract_strided_slice %0 {offsets = [0, 80], sizes = [8, 16], strides = [1, 1]} : vector<8x192xbf16> to vector<8x16xbf16>
    %32 = vector.extract_strided_slice %0 {offsets = [0, 144], sizes = [8, 16], strides = [1, 1]} : vector<8x192xbf16> to vector<8x16xbf16>
    %33 = tpu.transpose %31, [1, 0] : vector<8x16xbf16> -> vector<16x8xbf16>
    %cst_13 = arith.constant dense<0.000000e+00> : vector<8x8xf32>
    %34 = tpu.matmul %30, %33, %cst_13 {dimension_numbers = #tpu.dot_dimension_numbers<[1], [0], [0], [1], [0, 0, 1, 1], [], []>} : vector<8x16xbf16>, vector<16x8xbf16>, vector<8x8xf32> -> vector<8x8xf32>
    %cst_14 = arith.constant -3.40282347E+38 : f32
    %35 = vector.broadcast %cst_14 : f32 to vector<8x8xf32>
    %36 = arith.select %3, %34, %35 : vector<8x8xi1>, vector<8x8xf32>
    %cst_15 = arith.constant dense<0xFF800000> : vector<8xf32>
    %37 = vector.multi_reduction <maximumf>, %36, %cst_15 [1] : vector<8x8xf32> to vector<8xf32>
    %38 = vector.shape_cast %37 : vector<8xf32> to vector<8x1xf32>
    %39 = vector.broadcast %38 : vector<8x1xf32> to vector<8x8xf32>
    %40 = arith.subf %36, %39 : vector<8x8xf32>
    %41 = math.exp %40 : vector<8x8xf32>
    %cst_16 = arith.constant dense<0.000000e+00> : vector<8xf32>
    %42 = vector.multi_reduction <add>, %41, %cst_16 [1] : vector<8x8xf32> to vector<8xf32>
    %43 = vector.shape_cast %42 : vector<8xf32> to vector<8x1xf32>
    %44 = tpu.reciprocal %43 {approx = true} : vector<8x1xf32> -> vector<8x1xf32>
    %45 = vector.broadcast %44 : vector<8x1xf32> to vector<8x8xf32>
    %46 = arith.mulf %41, %45 : vector<8x8xf32>
    %47 = arith.truncf %46 : vector<8x8xf32> to vector<8x8xbf16>
    %cst_17 = arith.constant dense<0.000000e+00> : vector<8x16xf32>
    %48 = tpu.matmul %47, %32, %cst_17 {dimension_numbers = #tpu.dot_dimension_numbers<[1], [0], [0], [1], [0, 0, 1, 1], [], []>} : vector<8x8xbf16>, vector<8x16xbf16>, vector<8x16xf32> -> vector<8x16xf32>
    %49 = arith.truncf %48 : vector<8x16xf32> to vector<8x16xbf16>
    %c0_18 = arith.constant 0 : index
    %c1 = arith.constant 1 : index
    %c0_19 = arith.constant 0 : index
    %c0_20 = arith.constant 0 : index
    %50 = vector.load %arg3[%c0_18, %c1, %c0_19, %c0_20] : memref<1x4x8x16xbf16, #tpu.memory_space<vmem>>, vector<1x1x8x16xbf16>
    %51 = vector.shape_cast %50 : vector<1x1x8x16xbf16> to vector<8x16xbf16>
    %52 = vector.shape_cast %31 : vector<8x16xbf16> to vector<1x1x8x16xbf16>
    tpu.vector_store %arg3[%c0_18, %c1, %c0_19, %c0_20], %52 {strides = array<i32>} : memref<1x4x8x16xbf16, #tpu.memory_space<vmem>>, vector<1x1x8x16xbf16>,
    %c0_21 = arith.constant 0 : index
    %c1_22 = arith.constant 1 : index
    %c0_23 = arith.constant 0 : index
    %c0_24 = arith.constant 0 : index
    %53 = vector.load %arg4[%c0_21, %c1_22, %c0_23, %c0_24] : memref<1x4x8x16xbf16, #tpu.memory_space<vmem>>, vector<1x1x8x16xbf16>
    %54 = vector.shape_cast %53 : vector<1x1x8x16xbf16> to vector<8x16xbf16>
    %55 = vector.shape_cast %32 : vector<8x16xbf16> to vector<1x1x8x16xbf16>
    tpu.vector_store %arg4[%c0_21, %c1_22, %c0_23, %c0_24], %55 {strides = array<i32>} : memref<1x4x8x16xbf16, #tpu.memory_space<vmem>>, vector<1x1x8x16xbf16>,
    %56 = vector.extract_strided_slice %0 {offsets = [0, 32], sizes = [8, 16], strides = [1, 1]} : vector<8x192xbf16> to vector<8x16xbf16>
    %57 = vector.extract_strided_slice %0 {offsets = [0, 96], sizes = [8, 16], strides = [1, 1]} : vector<8x192xbf16> to vector<8x16xbf16>
    %58 = vector.extract_strided_slice %0 {offsets = [0, 160], sizes = [8, 16], strides = [1, 1]} : vector<8x192xbf16> to vector<8x16xbf16>
    %59 = tpu.transpose %57, [1, 0] : vector<8x16xbf16> -> vector<16x8xbf16>
    %cst_25 = arith.constant dense<0.000000e+00> : vector<8x8xf32>
    %60 = tpu.matmul %56, %59, %cst_25 {dimension_numbers = #tpu.dot_dimension_numbers<[1], [0], [0], [1], [0, 0, 1, 1], [], []>} : vector<8x16xbf16>, vector<16x8xbf16>, vector<8x8xf32> -> vector<8x8xf32>
    %cst_26 = arith.constant -3.40282347E+38 : f32
    %61 = vector.broadcast %cst_26 : f32 to vector<8x8xf32>
    %62 = arith.select %3, %60, %61 : vector<8x8xi1>, vector<8x8xf32>
    %cst_27 = arith.constant dense<0xFF800000> : vector<8xf32>
    %63 = vector.multi_reduction <maximumf>, %62, %cst_27 [1] : vector<8x8xf32> to vector<8xf32>
    %64 = vector.shape_cast %63 : vector<8xf32> to vector<8x1xf32>
    %65 = vector.broadcast %64 : vector<8x1xf32> to vector<8x8xf32>
    %66 = arith.subf %62, %65 : vector<8x8xf32>
    %67 = math.exp %66 : vector<8x8xf32>
    %cst_28 = arith.constant dense<0.000000e+00> : vector<8xf32>
    %68 = vector.multi_reduction <add>, %67, %cst_28 [1] : vector<8x8xf32> to vector<8xf32>
    %69 = vector.shape_cast %68 : vector<8xf32> to vector<8x1xf32>
    %70 = tpu.reciprocal %69 {approx = true} : vector<8x1xf32> -> vector<8x1xf32>
    %71 = vector.broadcast %70 : vector<8x1xf32> to vector<8x8xf32>
    %72 = arith.mulf %67, %71 : vector<8x8xf32>
    %73 = arith.truncf %72 : vector<8x8xf32> to vector<8x8xbf16>
    %cst_29 = arith.constant dense<0.000000e+00> : vector<8x16xf32>
    %74 = tpu.matmul %73, %58, %cst_29 {dimension_numbers = #tpu.dot_dimension_numbers<[1], [0], [0], [1], [0, 0, 1, 1], [], []>} : vector<8x8xbf16>, vector<8x16xbf16>, vector<8x16xf32> -> vector<8x16xf32>
    %75 = arith.truncf %74 : vector<8x16xf32> to vector<8x16xbf16>
    %c0_30 = arith.constant 0 : index
    %c2 = arith.constant 2 : index
    %c0_31 = arith.constant 0 : index
    %c0_32 = arith.constant 0 : index
    %76 = vector.load %arg3[%c0_30, %c2, %c0_31, %c0_32] : memref<1x4x8x16xbf16, #tpu.memory_space<vmem>>, vector<1x1x8x16xbf16>
    %77 = vector.shape_cast %76 : vector<1x1x8x16xbf16> to vector<8x16xbf16>
    %78 = vector.shape_cast %57 : vector<8x16xbf16> to vector<1x1x8x16xbf16>
    tpu.vector_store %arg3[%c0_30, %c2, %c0_31, %c0_32], %78 {strides = array<i32>} : memref<1x4x8x16xbf16, #tpu.memory_space<vmem>>, vector<1x1x8x16xbf16>,
    %c0_33 = arith.constant 0 : index
    %c2_34 = arith.constant 2 : index
    %c0_35 = arith.constant 0 : index
    %c0_36 = arith.constant 0 : index
    %79 = vector.load %arg4[%c0_33, %c2_34, %c0_35, %c0_36] : memref<1x4x8x16xbf16, #tpu.memory_space<vmem>>, vector<1x1x8x16xbf16>
    %80 = vector.shape_cast %79 : vector<1x1x8x16xbf16> to vector<8x16xbf16>
    %81 = vector.shape_cast %58 : vector<8x16xbf16> to vector<1x1x8x16xbf16>
    tpu.vector_store %arg4[%c0_33, %c2_34, %c0_35, %c0_36], %81 {strides = array<i32>} : memref<1x4x8x16xbf16, #tpu.memory_space<vmem>>, vector<1x1x8x16xbf16>,
    %82 = vector.extract_strided_slice %0 {offsets = [0, 48], sizes = [8, 16], strides = [1, 1]} : vector<8x192xbf16> to vector<8x16xbf16>
    %83 = vector.extract_strided_slice %0 {offsets = [0, 112], sizes = [8, 16], strides = [1, 1]} : vector<8x192xbf16> to vector<8x16xbf16>
    %84 = vector.extract_strided_slice %0 {offsets = [0, 176], sizes = [8, 16], strides = [1, 1]} : vector<8x192xbf16> to vector<8x16xbf16>
    %85 = tpu.transpose %83, [1, 0] : vector<8x16xbf16> -> vector<16x8xbf16>
    %cst_37 = arith.constant dense<0.000000e+00> : vector<8x8xf32>
    %86 = tpu.matmul %82, %85, %cst_37 {dimension_numbers = #tpu.dot_dimension_numbers<[1], [0], [0], [1], [0, 0, 1, 1], [], []>} : vector<8x16xbf16>, vector<16x8xbf16>, vector<8x8xf32> -> vector<8x8xf32>
    %cst_38 = arith.constant -3.40282347E+38 : f32
    %87 = vector.broadcast %cst_38 : f32 to vector<8x8xf32>
    %88 = arith.select %3, %86, %87 : vector<8x8xi1>, vector<8x8xf32>
    %cst_39 = arith.constant dense<0xFF800000> : vector<8xf32>
    %89 = vector.multi_reduction <maximumf>, %88, %cst_39 [1] : vector<8x8xf32> to vector<8xf32>
    %90 = vector.shape_cast %89 : vector<8xf32> to vector<8x1xf32>
    %91 = vector.broadcast %90 : vector<8x1xf32> to vector<8x8xf32>
    %92 = arith.subf %88, %91 : vector<8x8xf32>
    %93 = math.exp %92 : vector<8x8xf32>
    %cst_40 = arith.constant dense<0.000000e+00> : vector<8xf32>
    %94 = vector.multi_reduction <add>, %93, %cst_40 [1] : vector<8x8xf32> to vector<8xf32>
    %95 = vector.shape_cast %94 : vector<8xf32> to vector<8x1xf32>
    %96 = tpu.reciprocal %95 {approx = true} : vector<8x1xf32> -> vector<8x1xf32>
    %97 = vector.broadcast %96 : vector<8x1xf32> to vector<8x8xf32>
    %98 = arith.mulf %93, %97 : vector<8x8xf32>
    %99 = arith.truncf %98 : vector<8x8xf32> to vector<8x8xbf16>
    %cst_41 = arith.constant dense<0.000000e+00> : vector<8x16xf32>
    %100 = tpu.matmul %99, %84, %cst_41 {dimension_numbers = #tpu.dot_dimension_numbers<[1], [0], [0], [1], [0, 0, 1, 1], [], []>} : vector<8x8xbf16>, vector<8x16xbf16>, vector<8x16xf32> -> vector<8x16xf32>
    %101 = arith.truncf %100 : vector<8x16xf32> to vector<8x16xbf16>
    %c0_42 = arith.constant 0 : index
    %c3 = arith.constant 3 : index
    %c0_43 = arith.constant 0 : index
    %c0_44 = arith.constant 0 : index
    %102 = vector.load %arg3[%c0_42, %c3, %c0_43, %c0_44] : memref<1x4x8x16xbf16, #tpu.memory_space<vmem>>, vector<1x1x8x16xbf16>
    %103 = vector.shape_cast %102 : vector<1x1x8x16xbf16> to vector<8x16xbf16>
    %104 = vector.shape_cast %83 : vector<8x16xbf16> to vector<1x1x8x16xbf16>
    tpu.vector_store %arg3[%c0_42, %c3, %c0_43, %c0_44], %104 {strides = array<i32>} : memref<1x4x8x16xbf16, #tpu.memory_space<vmem>>, vector<1x1x8x16xbf16>,
    %c0_45 = arith.constant 0 : index
    %c3_46 = arith.constant 3 : index
    %c0_47 = arith.constant 0 : index
    %c0_48 = arith.constant 0 : index
    %105 = vector.load %arg4[%c0_45, %c3_46, %c0_47, %c0_48] : memref<1x4x8x16xbf16, #tpu.memory_space<vmem>>, vector<1x1x8x16xbf16>
    %106 = vector.shape_cast %105 : vector<1x1x8x16xbf16> to vector<8x16xbf16>
    %107 = vector.shape_cast %84 : vector<8x16xbf16> to vector<1x1x8x16xbf16>
    tpu.vector_store %arg4[%c0_45, %c3_46, %c0_47, %c0_48], %107 {strides = array<i32>} : memref<1x4x8x16xbf16, #tpu.memory_space<vmem>>, vector<1x1x8x16xbf16>,
    %108 = tpu.concatenate %23, %49, %75, %101 in 1 : vector<8x16xbf16>, vector<8x16xbf16>, vector<8x16xbf16>, vector<8x16xbf16> -> vector<8x64xbf16>
    %c0_49 = arith.constant 0 : index
    %c0_50 = arith.constant 0 : index
    %109 = vector.load %arg2[%c0_49, %c0_50] : memref<8x64xbf16, #tpu.memory_space<vmem>>, vector<8x64xbf16>
    tpu.vector_store %arg2[%c0_49, %c0_50], %108 {strides = array<i32>} : memref<8x64xbf16, #tpu.memory_space<vmem>>, vector<8x64xbf16>,
    return
  }
  func.func @transform_0(%arg0: i32) -> (i32, i32) {
    %c0_i32 = arith.constant 0 : i32
    %c0_i32_0 = arith.constant 0 : i32
    return %arg0, %c0_i32 : i32, i32
  }
  func.func @transform_1(%arg0: i32) -> (i32, i32) {
    %c0_i32 = arith.constant 0 : i32
    %c0_i32_0 = arith.constant 0 : i32
    return %arg0, %c0_i32 : i32, i32
  }
  func.func @transform_2(%arg0: i32) -> (i32, i32, i32, i32) {
    %c0_i32 = arith.constant 0 : i32
    %c0_i32_0 = arith.constant 0 : i32
    %c0_i32_1 = arith.constant 0 : i32
    %c0_i32_2 = arith.constant 0 : i32
    return %arg0, %c0_i32, %c0_i32_0, %c0_i32_1 : i32, i32, i32, i32
  }
  func.func @transform_3(%arg0: i32) -> (i32, i32, i32, i32) {
    %c0_i32 = arith.constant 0 : i32
    %c0_i32_0 = arith.constant 0 : i32
    %c0_i32_1 = arith.constant 0 : i32
    %c0_i32_2 = arith.constant 0 : i32
    return %arg0, %c0_i32, %c0_i32_0, %c0_i32_1 : i32, i32, i32, i32
  }
}

module attributes {stable_mosaic.version = 11 : i64} {
  func.func @_linear_residual_kernel(%arg0: i32, %arg1: i32, %arg2: i32, %arg3: memref<16x64xbf16, #tpu.memory_space<vmem>>, %arg4: memref<64x64xbf16, #tpu.memory_space<vmem>>, %arg5: memref<1x64xf32, #tpu.memory_space<vmem>>, %arg6: memref<16x64xbf16, #tpu.memory_space<vmem>>, %arg7: memref<16x64xbf16, #tpu.memory_space<vmem>>, %arg8: memref<16x64xf32, #tpu.memory_space<vmem>>) attributes {dimension_semantics = [#tpu.dimension_semantics<parallel>, #tpu.dimension_semantics<parallel>, #tpu.dimension_semantics<arbitrary>], iteration_bounds = array<i64: 1, 1, 1>, scalar_prefetch = 0 : i64, scratch_operands = 1 : i64, tpu.core_type = #tpu.core_type<tc>, window_params = [{transform_indices = @transform_0, window_bounds = array<i64: 16, 64>}, {transform_indices = @transform_1, window_bounds = array<i64: 64, 64>}, {transform_indices = @transform_2, window_bounds = array<i64: 1, 64>}, {transform_indices = @transform_3, window_bounds = array<i64: 16, 64>}, {transform_indices = @transform_4, window_bounds = array<i64: 16, 64>}]} {
    %c0_i32 = arith.constant 0 : i32
    %0 = arith.cmpi eq, %arg2, %c0_i32 : i32
    %1 = arith.extui %0 : i1 to i32
    %c0_i32_0 = arith.constant 0 : i32
    %2 = arith.cmpi ne, %1, %c0_i32_0 : i32
    scf.if %2 {
      %cst_10 = arith.constant 0.000000e+00 : f32
      %12 = vector.broadcast %cst_10 : f32 to vector<16x64xf32>
      %c0_11 = arith.constant 0 : index
      %c0_12 = arith.constant 0 : index
      %13 = vector.load %arg8[%c0_11, %c0_12] : memref<16x64xf32, #tpu.memory_space<vmem>>, vector<16x64xf32>
      tpu.vector_store %arg8[%c0_11, %c0_12], %12 {strides = array<i32>} : memref<16x64xf32, #tpu.memory_space<vmem>>, vector<16x64xf32>,
    } else {
    }
    %c0 = arith.constant 0 : index
    %c0_1 = arith.constant 0 : index
    %3 = vector.load %arg8[%c0, %c0_1] : memref<16x64xf32, #tpu.memory_space<vmem>>, vector<16x64xf32>
    %c0_2 = arith.constant 0 : index
    %c0_3 = arith.constant 0 : index
    %4 = vector.load %arg3[%c0_2, %c0_3] : memref<16x64xbf16, #tpu.memory_space<vmem>>, vector<16x64xbf16>
    %c0_4 = arith.constant 0 : index
    %c0_5 = arith.constant 0 : index
    %5 = vector.load %arg4[%c0_4, %c0_5] : memref<64x64xbf16, #tpu.memory_space<vmem>>, vector<64x64xbf16>
    %cst = arith.constant dense<0.000000e+00> : vector<16x64xf32>
    %6 = tpu.matmul %4, %5, %cst {dimension_numbers = #tpu.dot_dimension_numbers<[1], [0], [0], [1], [0, 0, 1, 1], [], []>} : vector<16x64xbf16>, vector<64x64xbf16>, vector<16x64xf32> -> vector<16x64xf32>
    %7 = arith.addf %3, %6 : vector<16x64xf32>
    %c0_6 = arith.constant 0 : index
    %c0_7 = arith.constant 0 : index
    %8 = vector.load %arg8[%c0_6, %c0_7] : memref<16x64xf32, #tpu.memory_space<vmem>>, vector<16x64xf32>
    tpu.vector_store %arg8[%c0_6, %c0_7], %7 {strides = array<i32>} : memref<16x64xf32, #tpu.memory_space<vmem>>, vector<16x64xf32>,
    %c0_i32_8 = arith.constant 0 : i32
    %9 = arith.cmpi eq, %arg2, %c0_i32_8 : i32
    %10 = arith.extui %9 : i1 to i32
    %c0_i32_9 = arith.constant 0 : i32
    %11 = arith.cmpi ne, %10, %c0_i32_9 : i32
    scf.if %11 {
      %c0_10 = arith.constant 0 : index
      %c0_11 = arith.constant 0 : index
      %12 = vector.load %arg8[%c0_10, %c0_11] : memref<16x64xf32, #tpu.memory_space<vmem>>, vector<16x64xf32>
      %c0_12 = arith.constant 0 : index
      %c0_13 = arith.constant 0 : index
      %13 = vector.load %arg5[%c0_12, %c0_13] : memref<1x64xf32, #tpu.memory_space<vmem>>, vector<1x64xf32>
      %14 = vector.broadcast %13 : vector<1x64xf32> to vector<16x64xf32>
      %15 = arith.addf %12, %14 : vector<16x64xf32>
      %c0_14 = arith.constant 0 : index
      %c0_15 = arith.constant 0 : index
      %16 = vector.load %arg6[%c0_14, %c0_15] : memref<16x64xbf16, #tpu.memory_space<vmem>>, vector<16x64xbf16>
      %17 = arith.extf %16 : vector<16x64xbf16> to vector<16x64xf32>
      %18 = arith.addf %15, %17 : vector<16x64xf32>
      %19 = arith.truncf %18 : vector<16x64xf32> to vector<16x64xbf16>
      %c0_16 = arith.constant 0 : index
      %c0_17 = arith.constant 0 : index
      %20 = vector.load %arg7[%c0_16, %c0_17] : memref<16x64xbf16, #tpu.memory_space<vmem>>, vector<16x64xbf16>
      tpu.vector_store %arg7[%c0_16, %c0_17], %19 {strides = array<i32>} : memref<16x64xbf16, #tpu.memory_space<vmem>>, vector<16x64xbf16>,
    } else {
    }
    return
  }
  func.func @transform_0(%arg0: i32, %arg1: i32, %arg2: i32) -> (i32, i32) {
    %c0_i32 = arith.constant 0 : i32
    return %arg0, %arg2 : i32, i32
  }
  func.func @transform_1(%arg0: i32, %arg1: i32, %arg2: i32) -> (i32, i32) {
    %c0_i32 = arith.constant 0 : i32
    return %arg2, %arg1 : i32, i32
  }
  func.func @transform_2(%arg0: i32, %arg1: i32, %arg2: i32) -> (i32, i32) {
    %c0_i32 = arith.constant 0 : i32
    %c0_i32_0 = arith.constant 0 : i32
    return %c0_i32, %arg1 : i32, i32
  }
  func.func @transform_3(%arg0: i32, %arg1: i32, %arg2: i32) -> (i32, i32) {
    %c0_i32 = arith.constant 0 : i32
    return %arg0, %arg1 : i32, i32
  }
  func.func @transform_4(%arg0: i32, %arg1: i32, %arg2: i32) -> (i32, i32) {
    %c0_i32 = arith.constant 0 : i32
    return %arg0, %arg1 : i32, i32
  }
}

module attributes {stable_mosaic.version = 11 : i64} {
  func.func @_ln_linear_kernel(%arg0: i32, %arg1: i32, %arg2: memref<16x64xbf16, #tpu.memory_space<vmem>>, %arg3: memref<1x64xf32, #tpu.memory_space<vmem>>, %arg4: memref<1x64xf32, #tpu.memory_space<vmem>>, %arg5: memref<64x256xbf16, #tpu.memory_space<vmem>>, %arg6: memref<1x256xf32, #tpu.memory_space<vmem>>, %arg7: memref<16x256xbf16, #tpu.memory_space<vmem>>, %arg8: memref<16x64xbf16, #tpu.memory_space<vmem>>) attributes {dimension_semantics = [#tpu.dimension_semantics<parallel>, #tpu.dimension_semantics<arbitrary>], iteration_bounds = array<i64: 1, 1>, scalar_prefetch = 0 : i64, scratch_operands = 1 : i64, tpu.core_type = #tpu.core_type<tc>, window_params = [{transform_indices = @transform_0, window_bounds = array<i64: 16, 64>}, {pipeline_mode = #tpu.pipeline_mode<synchronous>, transform_indices = @transform_1, window_bounds = array<i64: 1, 64>}, {pipeline_mode = #tpu.pipeline_mode<synchronous>, transform_indices = @transform_2, window_bounds = array<i64: 1, 64>}, {transform_indices = @transform_3, window_bounds = array<i64: 64, 256>}, {transform_indices = @transform_4, window_bounds = array<i64: 1, 256>}, {transform_indices = @transform_5, window_bounds = array<i64: 16, 256>}]} {
    %c0_i32 = arith.constant 0 : i32
    %0 = arith.cmpi eq, %arg1, %c0_i32 : i32
    %1 = arith.extui %0 : i1 to i32
    %c0_i32_0 = arith.constant 0 : i32
    %2 = arith.cmpi ne, %1, %c0_i32_0 : i32
    scf.if %2 {
      %c0_12 = arith.constant 0 : index
      %c0_13 = arith.constant 0 : index
      %24 = vector.load %arg2[%c0_12, %c0_13] : memref<16x64xbf16, #tpu.memory_space<vmem>>, vector<16x64xbf16>
      %25 = arith.extf %24 : vector<16x64xbf16> to vector<16x64xf32>
      %cst_14 = arith.constant dense<0.000000e+00> : vector<16xf32>
      %26 = vector.multi_reduction <add>, %25, %cst_14 [1] : vector<16x64xf32> to vector<16xf32>
      %27 = vector.shape_cast %26 : vector<16xf32> to vector<16x1xf32>
      %cst_15 = arith.constant 6.400000e+01 : f32
      %28 = vector.broadcast %cst_15 : f32 to vector<16x1xf32>
      %29 = arith.divf %27, %28 : vector<16x1xf32>
      %30 = vector.broadcast %29 : vector<16x1xf32> to vector<16x64xf32>
      %31 = arith.subf %25, %30 : vector<16x64xf32>
      %32 = arith.mulf %31, %31 : vector<16x64xf32>
      %cst_16 = arith.constant dense<0.000000e+00> : vector<16xf32>
      %33 = vector.multi_reduction <add>, %32, %cst_16 [1] : vector<16x64xf32> to vector<16xf32>
      %34 = vector.shape_cast %33 : vector<16xf32> to vector<16x1xf32>
      %cst_17 = arith.constant 6.400000e+01 : f32
      %35 = vector.broadcast %cst_17 : f32 to vector<16x1xf32>
      %36 = arith.divf %34, %35 : vector<16x1xf32>
      %37 = vector.broadcast %29 : vector<16x1xf32> to vector<16x64xf32>
      %38 = arith.subf %25, %37 : vector<16x64xf32>
      %cst_18 = arith.constant 9.99999974E-6 : f32
      %39 = vector.broadcast %cst_18 : f32 to vector<16x1xf32>
      %40 = arith.addf %36, %39 : vector<16x1xf32>
      %41 = math.rsqrt %40 : vector<16x1xf32>
      %42 = vector.broadcast %41 : vector<16x1xf32> to vector<16x64xf32>
      %43 = arith.mulf %38, %42 : vector<16x64xf32>
      %c0_19 = arith.constant 0 : index
      %c0_20 = arith.constant 0 : index
      %44 = vector.load %arg3[%c0_19, %c0_20] : memref<1x64xf32, #tpu.memory_space<vmem>>, vector<1x64xf32>
      %45 = vector.broadcast %44 : vector<1x64xf32> to vector<16x64xf32>
      %46 = arith.mulf %43, %45 : vector<16x64xf32>
      %c0_21 = arith.constant 0 : index
      %c0_22 = arith.constant 0 : index
      %47 = vector.load %arg4[%c0_21, %c0_22] : memref<1x64xf32, #tpu.memory_space<vmem>>, vector<1x64xf32>
      %48 = vector.broadcast %47 : vector<1x64xf32> to vector<16x64xf32>
      %49 = arith.addf %46, %48 : vector<16x64xf32>
      %50 = arith.truncf %49 : vector<16x64xf32> to vector<16x64xbf16>
      %c0_23 = arith.constant 0 : index
      %c0_24 = arith.constant 0 : index
      %51 = vector.load %arg8[%c0_23, %c0_24] : memref<16x64xbf16, #tpu.memory_space<vmem>>, vector<16x64xbf16>
      tpu.vector_store %arg8[%c0_23, %c0_24], %50 {strides = array<i32>} : memref<16x64xbf16, #tpu.memory_space<vmem>>, vector<16x64xbf16>,
    } else {
    }
    %c0 = arith.constant 0 : index
    %c0_1 = arith.constant 0 : index
    %3 = vector.load %arg8[%c0, %c0_1] : memref<16x64xbf16, #tpu.memory_space<vmem>>, vector<16x64xbf16>
    %c0_2 = arith.constant 0 : index
    %c0_3 = arith.constant 0 : index
    %4 = vector.load %arg5[%c0_2, %c0_3] : memref<64x256xbf16, #tpu.memory_space<vmem>>, vector<64x256xbf16>
    %cst = arith.constant dense<0.000000e+00> : vector<16x256xf32>
    %5 = tpu.matmul %3, %4, %cst {dimension_numbers = #tpu.dot_dimension_numbers<[1], [0], [0], [1], [0, 0, 1, 1], [], []>} : vector<16x64xbf16>, vector<64x256xbf16>, vector<16x256xf32> -> vector<16x256xf32>
    %c0_4 = arith.constant 0 : index
    %c0_5 = arith.constant 0 : index
    %6 = vector.load %arg6[%c0_4, %c0_5] : memref<1x256xf32, #tpu.memory_space<vmem>>, vector<1x256xf32>
    %7 = vector.broadcast %6 : vector<1x256xf32> to vector<16x256xf32>
    %8 = arith.addf %5, %7 : vector<16x256xf32>
    %cst_6 = arith.constant 5.000000e-01 : f32
    %9 = vector.broadcast %cst_6 : f32 to vector<16x256xf32>
    %10 = arith.mulf %9, %8 : vector<16x256xf32>
    %11 = arith.mulf %8, %8 : vector<16x256xf32>
    %12 = arith.mulf %11, %8 : vector<16x256xf32>
    %cst_7 = arith.constant 4.471500e-02 : f32
    %13 = vector.broadcast %cst_7 : f32 to vector<16x256xf32>
    %14 = arith.mulf %13, %12 : vector<16x256xf32>
    %15 = arith.addf %8, %14 : vector<16x256xf32>
    %cst_8 = arith.constant 0.797884583 : f32
    %16 = vector.broadcast %cst_8 : f32 to vector<16x256xf32>
    %17 = arith.mulf %16, %15 : vector<16x256xf32>
    %18 = math.tanh %17 : vector<16x256xf32>
    %cst_9 = arith.constant 1.000000e+00 : f32
    %19 = vector.broadcast %cst_9 : f32 to vector<16x256xf32>
    %20 = arith.addf %19, %18 : vector<16x256xf32>
    %21 = arith.mulf %10, %20 : vector<16x256xf32>
    %22 = arith.truncf %21 : vector<16x256xf32> to vector<16x256xbf16>
    %c0_10 = arith.constant 0 : index
    %c0_11 = arith.constant 0 : index
    %23 = vector.load %arg7[%c0_10, %c0_11] : memref<16x256xbf16, #tpu.memory_space<vmem>>, vector<16x256xbf16>
    tpu.vector_store %arg7[%c0_10, %c0_11], %22 {strides = array<i32>} : memref<16x256xbf16, #tpu.memory_space<vmem>>, vector<16x256xbf16>,
    return
  }
  func.func @transform_0(%arg0: i32, %arg1: i32) -> (i32, i32) {
    %c0_i32 = arith.constant 0 : i32
    %c0_i32_0 = arith.constant 0 : i32
    return %arg0, %c0_i32 : i32, i32
  }
  func.func @transform_1(%arg0: i32, %arg1: i32) -> (i32, i32) {
    %c0_i32 = arith.constant 0 : i32
    %c0_i32_0 = arith.constant 0 : i32
    %c0_i32_1 = arith.constant 0 : i32
    return %c0_i32, %c0_i32_0 : i32, i32
  }
  func.func @transform_2(%arg0: i32, %arg1: i32) -> (i32, i32) {
    %c0_i32 = arith.constant 0 : i32
    %c0_i32_0 = arith.constant 0 : i32
    %c0_i32_1 = arith.constant 0 : i32
    return %c0_i32, %c0_i32_0 : i32, i32
  }
  func.func @transform_3(%arg0: i32, %arg1: i32) -> (i32, i32) {
    %c0_i32 = arith.constant 0 : i32
    %c0_i32_0 = arith.constant 0 : i32
    return %c0_i32, %arg1 : i32, i32
  }
  func.func @transform_4(%arg0: i32, %arg1: i32) -> (i32, i32) {
    %c0_i32 = arith.constant 0 : i32
    %c0_i32_0 = arith.constant 0 : i32
    return %c0_i32, %arg1 : i32, i32
  }
  func.func @transform_5(%arg0: i32, %arg1: i32) -> (i32, i32) {
    %c0_i32 = arith.constant 0 : i32
    return %arg0, %arg1 : i32, i32
  }
}

module attributes {stable_mosaic.version = 11 : i64} {
  func.func @_linear_residual_kernel(%arg0: i32, %arg1: i32, %arg2: i32, %arg3: memref<16x256xbf16, #tpu.memory_space<vmem>>, %arg4: memref<256x64xbf16, #tpu.memory_space<vmem>>, %arg5: memref<1x64xf32, #tpu.memory_space<vmem>>, %arg6: memref<16x64xbf16, #tpu.memory_space<vmem>>, %arg7: memref<16x64xbf16, #tpu.memory_space<vmem>>, %arg8: memref<16x64xf32, #tpu.memory_space<vmem>>) attributes {dimension_semantics = [#tpu.dimension_semantics<parallel>, #tpu.dimension_semantics<parallel>, #tpu.dimension_semantics<arbitrary>], iteration_bounds = array<i64: 1, 1, 1>, scalar_prefetch = 0 : i64, scratch_operands = 1 : i64, tpu.core_type = #tpu.core_type<tc>, window_params = [{transform_indices = @transform_0, window_bounds = array<i64: 16, 256>}, {transform_indices = @transform_1, window_bounds = array<i64: 256, 64>}, {transform_indices = @transform_2, window_bounds = array<i64: 1, 64>}, {transform_indices = @transform_3, window_bounds = array<i64: 16, 64>}, {transform_indices = @transform_4, window_bounds = array<i64: 16, 64>}]} {
    %c0_i32 = arith.constant 0 : i32
    %0 = arith.cmpi eq, %arg2, %c0_i32 : i32
    %1 = arith.extui %0 : i1 to i32
    %c0_i32_0 = arith.constant 0 : i32
    %2 = arith.cmpi ne, %1, %c0_i32_0 : i32
    scf.if %2 {
      %cst_10 = arith.constant 0.000000e+00 : f32
      %12 = vector.broadcast %cst_10 : f32 to vector<16x64xf32>
      %c0_11 = arith.constant 0 : index
      %c0_12 = arith.constant 0 : index
      %13 = vector.load %arg8[%c0_11, %c0_12] : memref<16x64xf32, #tpu.memory_space<vmem>>, vector<16x64xf32>
      tpu.vector_store %arg8[%c0_11, %c0_12], %12 {strides = array<i32>} : memref<16x64xf32, #tpu.memory_space<vmem>>, vector<16x64xf32>,
    } else {
    }
    %c0 = arith.constant 0 : index
    %c0_1 = arith.constant 0 : index
    %3 = vector.load %arg8[%c0, %c0_1] : memref<16x64xf32, #tpu.memory_space<vmem>>, vector<16x64xf32>
    %c0_2 = arith.constant 0 : index
    %c0_3 = arith.constant 0 : index
    %4 = vector.load %arg3[%c0_2, %c0_3] : memref<16x256xbf16, #tpu.memory_space<vmem>>, vector<16x256xbf16>
    %c0_4 = arith.constant 0 : index
    %c0_5 = arith.constant 0 : index
    %5 = vector.load %arg4[%c0_4, %c0_5] : memref<256x64xbf16, #tpu.memory_space<vmem>>, vector<256x64xbf16>
    %cst = arith.constant dense<0.000000e+00> : vector<16x64xf32>
    %6 = tpu.matmul %4, %5, %cst {dimension_numbers = #tpu.dot_dimension_numbers<[1], [0], [0], [1], [0, 0, 1, 1], [], []>} : vector<16x256xbf16>, vector<256x64xbf16>, vector<16x64xf32> -> vector<16x64xf32>
    %7 = arith.addf %3, %6 : vector<16x64xf32>
    %c0_6 = arith.constant 0 : index
    %c0_7 = arith.constant 0 : index
    %8 = vector.load %arg8[%c0_6, %c0_7] : memref<16x64xf32, #tpu.memory_space<vmem>>, vector<16x64xf32>
    tpu.vector_store %arg8[%c0_6, %c0_7], %7 {strides = array<i32>} : memref<16x64xf32, #tpu.memory_space<vmem>>, vector<16x64xf32>,
    %c0_i32_8 = arith.constant 0 : i32
    %9 = arith.cmpi eq, %arg2, %c0_i32_8 : i32
    %10 = arith.extui %9 : i1 to i32
    %c0_i32_9 = arith.constant 0 : i32
    %11 = arith.cmpi ne, %10, %c0_i32_9 : i32
    scf.if %11 {
      %c0_10 = arith.constant 0 : index
      %c0_11 = arith.constant 0 : index
      %12 = vector.load %arg8[%c0_10, %c0_11] : memref<16x64xf32, #tpu.memory_space<vmem>>, vector<16x64xf32>
      %c0_12 = arith.constant 0 : index
      %c0_13 = arith.constant 0 : index
      %13 = vector.load %arg5[%c0_12, %c0_13] : memref<1x64xf32, #tpu.memory_space<vmem>>, vector<1x64xf32>
      %14 = vector.broadcast %13 : vector<1x64xf32> to vector<16x64xf32>
      %15 = arith.addf %12, %14 : vector<16x64xf32>
      %c0_14 = arith.constant 0 : index
      %c0_15 = arith.constant 0 : index
      %16 = vector.load %arg6[%c0_14, %c0_15] : memref<16x64xbf16, #tpu.memory_space<vmem>>, vector<16x64xbf16>
      %17 = arith.extf %16 : vector<16x64xbf16> to vector<16x64xf32>
      %18 = arith.addf %15, %17 : vector<16x64xf32>
      %19 = arith.truncf %18 : vector<16x64xf32> to vector<16x64xbf16>
      %c0_16 = arith.constant 0 : index
      %c0_17 = arith.constant 0 : index
      %20 = vector.load %arg7[%c0_16, %c0_17] : memref<16x64xbf16, #tpu.memory_space<vmem>>, vector<16x64xbf16>
      tpu.vector_store %arg7[%c0_16, %c0_17], %19 {strides = array<i32>} : memref<16x64xbf16, #tpu.memory_space<vmem>>, vector<16x64xbf16>,
    } else {
    }
    return
  }
  func.func @transform_0(%arg0: i32, %arg1: i32, %arg2: i32) -> (i32, i32) {
    %c0_i32 = arith.constant 0 : i32
    return %arg0, %arg2 : i32, i32
  }
  func.func @transform_1(%arg0: i32, %arg1: i32, %arg2: i32) -> (i32, i32) {
    %c0_i32 = arith.constant 0 : i32
    return %arg2, %arg1 : i32, i32
  }
  func.func @transform_2(%arg0: i32, %arg1: i32, %arg2: i32) -> (i32, i32) {
    %c0_i32 = arith.constant 0 : i32
    %c0_i32_0 = arith.constant 0 : i32
    return %c0_i32, %arg1 : i32, i32
  }
  func.func @transform_3(%arg0: i32, %arg1: i32, %arg2: i32) -> (i32, i32) {
    %c0_i32 = arith.constant 0 : i32
    return %arg0, %arg1 : i32, i32
  }
  func.func @transform_4(%arg0: i32, %arg1: i32, %arg2: i32) -> (i32, i32) {
    %c0_i32 = arith.constant 0 : i32
    return %arg0, %arg1 : i32, i32
  }
}

module attributes {stable_mosaic.version = 11 : i64} {
  func.func @_ln_linear_kernel(%arg0: i32, %arg1: i32, %arg2: memref<16x64xbf16, #tpu.memory_space<vmem>>, %arg3: memref<1x64xf32, #tpu.memory_space<vmem>>, %arg4: memref<1x64xf32, #tpu.memory_space<vmem>>, %arg5: memref<64x128xbf16, #tpu.memory_space<vmem>>, %arg6: memref<16x128xf32, #tpu.memory_space<vmem>>, %arg7: memref<16x64xbf16, #tpu.memory_space<vmem>>) attributes {dimension_semantics = [#tpu.dimension_semantics<parallel>, #tpu.dimension_semantics<arbitrary>], iteration_bounds = array<i64: 1, 1>, scalar_prefetch = 0 : i64, scratch_operands = 1 : i64, tpu.core_type = #tpu.core_type<tc>, window_params = [{transform_indices = @transform_0, window_bounds = array<i64: 16, 64>}, {pipeline_mode = #tpu.pipeline_mode<synchronous>, transform_indices = @transform_1, window_bounds = array<i64: 1, 64>}, {pipeline_mode = #tpu.pipeline_mode<synchronous>, transform_indices = @transform_2, window_bounds = array<i64: 1, 64>}, {transform_indices = @transform_3, window_bounds = array<i64: 64, 128>}, {transform_indices = @transform_4, window_bounds = array<i64: 16, 128>}]} {
    %c0_i32 = arith.constant 0 : i32
    %0 = arith.cmpi eq, %arg1, %c0_i32 : i32
    %1 = arith.extui %0 : i1 to i32
    %c0_i32_0 = arith.constant 0 : i32
    %2 = arith.cmpi ne, %1, %c0_i32_0 : i32
    scf.if %2 {
      %c0_6 = arith.constant 0 : index
      %c0_7 = arith.constant 0 : index
      %7 = vector.load %arg2[%c0_6, %c0_7] : memref<16x64xbf16, #tpu.memory_space<vmem>>, vector<16x64xbf16>
      %8 = arith.extf %7 : vector<16x64xbf16> to vector<16x64xf32>
      %cst_8 = arith.constant dense<0.000000e+00> : vector<16xf32>
      %9 = vector.multi_reduction <add>, %8, %cst_8 [1] : vector<16x64xf32> to vector<16xf32>
      %10 = vector.shape_cast %9 : vector<16xf32> to vector<16x1xf32>
      %cst_9 = arith.constant 6.400000e+01 : f32
      %11 = vector.broadcast %cst_9 : f32 to vector<16x1xf32>
      %12 = arith.divf %10, %11 : vector<16x1xf32>
      %13 = vector.broadcast %12 : vector<16x1xf32> to vector<16x64xf32>
      %14 = arith.subf %8, %13 : vector<16x64xf32>
      %15 = arith.mulf %14, %14 : vector<16x64xf32>
      %cst_10 = arith.constant dense<0.000000e+00> : vector<16xf32>
      %16 = vector.multi_reduction <add>, %15, %cst_10 [1] : vector<16x64xf32> to vector<16xf32>
      %17 = vector.shape_cast %16 : vector<16xf32> to vector<16x1xf32>
      %cst_11 = arith.constant 6.400000e+01 : f32
      %18 = vector.broadcast %cst_11 : f32 to vector<16x1xf32>
      %19 = arith.divf %17, %18 : vector<16x1xf32>
      %20 = vector.broadcast %12 : vector<16x1xf32> to vector<16x64xf32>
      %21 = arith.subf %8, %20 : vector<16x64xf32>
      %cst_12 = arith.constant 9.99999974E-6 : f32
      %22 = vector.broadcast %cst_12 : f32 to vector<16x1xf32>
      %23 = arith.addf %19, %22 : vector<16x1xf32>
      %24 = math.rsqrt %23 : vector<16x1xf32>
      %25 = vector.broadcast %24 : vector<16x1xf32> to vector<16x64xf32>
      %26 = arith.mulf %21, %25 : vector<16x64xf32>
      %c0_13 = arith.constant 0 : index
      %c0_14 = arith.constant 0 : index
      %27 = vector.load %arg3[%c0_13, %c0_14] : memref<1x64xf32, #tpu.memory_space<vmem>>, vector<1x64xf32>
      %28 = vector.broadcast %27 : vector<1x64xf32> to vector<16x64xf32>
      %29 = arith.mulf %26, %28 : vector<16x64xf32>
      %c0_15 = arith.constant 0 : index
      %c0_16 = arith.constant 0 : index
      %30 = vector.load %arg4[%c0_15, %c0_16] : memref<1x64xf32, #tpu.memory_space<vmem>>, vector<1x64xf32>
      %31 = vector.broadcast %30 : vector<1x64xf32> to vector<16x64xf32>
      %32 = arith.addf %29, %31 : vector<16x64xf32>
      %33 = arith.truncf %32 : vector<16x64xf32> to vector<16x64xbf16>
      %c0_17 = arith.constant 0 : index
      %c0_18 = arith.constant 0 : index
      %34 = vector.load %arg7[%c0_17, %c0_18] : memref<16x64xbf16, #tpu.memory_space<vmem>>, vector<16x64xbf16>
      tpu.vector_store %arg7[%c0_17, %c0_18], %33 {strides = array<i32>} : memref<16x64xbf16, #tpu.memory_space<vmem>>, vector<16x64xbf16>,
    } else {
    }
    %c0 = arith.constant 0 : index
    %c0_1 = arith.constant 0 : index
    %3 = vector.load %arg7[%c0, %c0_1] : memref<16x64xbf16, #tpu.memory_space<vmem>>, vector<16x64xbf16>
    %c0_2 = arith.constant 0 : index
    %c0_3 = arith.constant 0 : index
    %4 = vector.load %arg5[%c0_2, %c0_3] : memref<64x128xbf16, #tpu.memory_space<vmem>>, vector<64x128xbf16>
    %cst = arith.constant dense<0.000000e+00> : vector<16x128xf32>
    %5 = tpu.matmul %3, %4, %cst {dimension_numbers = #tpu.dot_dimension_numbers<[1], [0], [0], [1], [0, 0, 1, 1], [], []>} : vector<16x64xbf16>, vector<64x128xbf16>, vector<16x128xf32> -> vector<16x128xf32>
    %c0_4 = arith.constant 0 : index
    %c0_5 = arith.constant 0 : index
    %6 = vector.load %arg6[%c0_4, %c0_5] : memref<16x128xf32, #tpu.memory_space<vmem>>, vector<16x128xf32>
    tpu.vector_store %arg6[%c0_4, %c0_5], %5 {strides = array<i32>} : memref<16x128xf32, #tpu.memory_space<vmem>>, vector<16x128xf32>,
    return
  }
  func.func @transform_0(%arg0: i32, %arg1: i32) -> (i32, i32) {
    %c0_i32 = arith.constant 0 : i32
    %c0_i32_0 = arith.constant 0 : i32
    return %arg0, %c0_i32 : i32, i32
  }
  func.func @transform_1(%arg0: i32, %arg1: i32) -> (i32, i32) {
    %c0_i32 = arith.constant 0 : i32
    %c0_i32_0 = arith.constant 0 : i32
    %c0_i32_1 = arith.constant 0 : i32
    return %c0_i32, %c0_i32_0 : i32, i32
  }
  func.func @transform_2(%arg0: i32, %arg1: i32) -> (i32, i32) {
    %c0_i32 = arith.constant 0 : i32
    %c0_i32_0 = arith.constant 0 : i32
    %c0_i32_1 = arith.constant 0 : i32
    return %c0_i32, %c0_i32_0 : i32, i32
  }
  func.func @transform_3(%arg0: i32, %arg1: i32) -> (i32, i32) {
    %c0_i32 = arith.constant 0 : i32
    %c0_i32_0 = arith.constant 0 : i32
    return %c0_i32, %arg1 : i32, i32
  }
  func.func @transform_4(%arg0: i32, %arg1: i32) -> (i32, i32) {
    %c0_i32 = arith.constant 0 : i32
    return %arg0, %arg1 : i32, i32
  }
}

</mosaic_0001>

<bundles_post_ra>
// kernel: _lambda_.11
= control target key start
LH: loop header
LB: loop body
LE: loop exit
PB: predicated region body
PF: predicated region fallthrough
CT: control target
= control target key end

     0   :  { %vm29_vm0 = vcmask 523264   ;;  %v242_v23 = vmov 0   ;;  %v88_v42 = vlaneseq  ;;  %vm197_vm1 = vcmask 1043456   ;;  %s321_s0 = inlined_call_operand.vmem [shape: bf16[16,64], index: 0, kind: input, shape index: {}]   ;;  %s322_s3 = inlined_call_operand.vmem [shape: bf16[64,192], index: 3, kind: input, shape index: {}]   ;;  %s323_s1 = inlined_call_operand.vmem [shape: f32[1,64], index: 1, kind: input, shape index: {}]   ;;  %s324_s2 = inlined_call_operand.vmem [shape: f32[1,64], index: 2, kind: input, shape index: {}]   ;;  %s325_s4 = inlined_call_operand.vmem [shape: f32[1,192], index: 4, kind: input, shape index: {}]   ;;  %s326_s5 = inlined_call_operand.vmem [shape: bf16[16,192], index: 5, kind: output, shape index: {}]  }
   0x1   :  { %v222_v0 = vld [vmem:[%s321_s0] sm:$0xff]   ;;  %v229_v17 = vld [vmem:[%s322_s3 + $0x14] ss:$8 sps:$4 sm:$0xff]   ;;  %v231_v18 = vld [vmem:[%s322_s3 + $0x10] ss:$8 sps:$4 sm:$0xff]   ;;  %174 = vmatprep.mubr.bf16.mxu0 %v242_v23  ;;  %vm198_vm2 = vcmask 523268  }
   0x2   :  { %v223_v1 = vunpack.c.l.bf16 %v222_v0  ;;  %v224_v2 = vunpack.c.h.bf16 %v222_v0  ;;  %v226_v15 = vld [vmem:[%s322_s3 + $0x4] ss:$8 sps:$4 sm:$0xff]   ;;  %v228_v16 = vld [vmem:[%s322_s3] ss:$8 sps:$4 sm:$0xff]   ;;  %v235_v21 = vld [vmem:[%s322_s3 + $0x34] ss:$8 sps:$4 sm:$0xff]  }
   0x3   :  { %142 = vmatprep.subr.bf16.mxu0 %v226_v15  ;;  %v232_v19 = vld [vmem:[%s322_s3 + $0x24] ss:$8 sps:$4 sm:$0xff]   ;;  %v234_v20 = vld [vmem:[%s322_s3 + $0x20] ss:$8 sps:$4 sm:$0xff]   ;;  %v237_v22 = vld [vmem:[%s322_s3 + $0x30] ss:$8 sps:$4 sm:$0xff]  }
   0x4   :  { %v30_v3 = vsel %vm29_vm0, %v223_v1, 0.0  ;;  %v33_v4 = vsel %vm29_vm0, %v224_v2, 0.0  ;;  %143 = vmatpush1.bf16.msra.mxu0 %v228_v16  ;;  %v206_v32 = vld [vmem:[%s323_s1] ss:$0 sm:$0xff]  ;;  %v89_v43 = vshrl.u32 %v88_v42, 7  ;;  %vm199_vm3 = vmor %vm198_vm2, %vm197_vm1 }
   0x5   :  { %31 = vadd.xlane.f32.xlu0 %v30_v3  ;;  %144 = vmatprep.subr.bf16.mxu0 %v229_v17  ;;  %v207_v36 = vld [vmem:[%s324_s2] ss:$0 sm:$0xff] }
   0x6   :  { %v90_v44 = vsub.s32 0, %v89_v43  ;;  %v86_v45 = vld [vmem:[%s325_s4] sm:$0x3]  ;;  %v94_v46 = vsub.s32 1, %v89_v43 }
   0x8   :  { %145 = vmatpush1.bf16.msra.mxu0 %v231_v18  ;;  %v91_v47 = vrot.slane %v86_v45, %v90_v44  ;;  %v95_v48 = vrot.slane %v86_v45, %v94_v46 }
   0x9   :  { %34 = vadd.xlane.f32.xlu0 %v33_v4  ;;  %146 = vmatprep.subr.bf16.mxu0 %v232_v19 }
   0xc   :  { %147 = vmatpush1.bf16.msra.mxu0 %v234_v20 }
   0xd   :  { %148 = vmatprep.subr.bf16.mxu0 %v235_v21 }
  0x10   :  { %149 = vmatpush1.bf16.msra.mxu0 %v237_v22 }
  0x92   :  { %v32_v5 = vpop.xlane.xlu0 %31 }
  0x93   :  { %v37_v6 = vmul.f32 0.015625, %v32_v5 }
  0x95   :  { %v39_v7 = vsub.f32 %v223_v1, %v37_v6 }
  0x96   :  { %v35_v8 = vpop.xlane.xlu0 %34 }
  0x97   :  { %v38_v9 = vmul.f32 0.015625, %v35_v8  ;;  %v41_v10 = vmul.f32 %v39_v7, %v39_v7 }
  0x99   :  { %v40_v11 = vsub.f32 %v224_v2, %v38_v9  ;;  %v43_v12 = vsel %vm29_vm0, %v41_v10, 0.0 }
  0x9a   :  { %44 = vadd.xlane.f32.xlu1 %v43_v12 }
  0x9b   :  { %v42_v13 = vmul.f32 %v40_v11, %v40_v11 }
  0x9d   :  { %v46_v14 = vsel %vm29_vm0, %v42_v13, 0.0 }
  0x9e   :  { %47 = vadd.xlane.f32.xlu1 %v46_v14 }
 0x127   :  { %v45_v24 = vpop.xlane.xlu1 %44 }
 0x128   :  { %v49_v25 = vmul.f32 0.015625, %v45_v24 }
 0x12a   :  { %v51_v26 = vadd.f32 1e-05, %v49_v25 }
 0x12b   :  { %v48_v27 = vpop.xlane.xlu1 %47 }
 0x12c   :  { %238 = vrsqrt.f32 %v51_v26  ;;  %v50_v28 = vmul.f32 0.015625, %v48_v27 }
 0x12e   :  { %v52_v29 = vadd.f32 1e-05, %v50_v28 }
 0x130   :  { %240 = vrsqrt.f32 %v52_v29 }
 0x136   :  { %v239_v30 = vpop.eup %238 }
 0x137   :  { %v55_v31 = vmul.f32 %v239_v30, %v39_v7 }
 0x139   :  { %v64_v34 = vmul.f32 %v206_v32, %v55_v31 }
 0x13a   :  { %v241_v33 = vpop.eup %240 }
 0x13b   :  { %v56_v35 = vmul.f32 %v241_v33, %v40_v11  ;;  %v73_v38 = vadd.f32 %v207_v36, %v64_v34 }
 0x13d   :  { %v65_v37 = vmul.f32 %v206_v32, %v56_v35 }
 0x13f   :  { %v74_v39 = vadd.f32 %v207_v36, %v65_v37 }
 0x141   :  { %v75_v40 = vpack.c.bf16 %v74_v39, %v73_v38 }
 0x143   :  { %76 = vst.msk [vmem:[#allocation2] sm:$0xff] %vm29_vm0, %v75_v40 }
 0x14a   :  { %v77_v41 = vld [vmem:[#allocation2] sm:$0xff] }
 0x14b   :  { %216 = vmatmul.mubr.msk.bf16.vlgmr.msra.gmra.mrb[0].mxu0 %vm29_vm0, %v77_v41 }
 0x21e   :  { %v176_v49 = vpop.f32.mrb[0].mxu0 }
 0x21f   :  { %v177_v50 = vadd.f32 %v176_v49, %v91_v47  ;;  %v178_v51 = vpop.f32.mrb[1].mxu0 }
 0x220   :  { %v179_v52 = vadd.f32 %v178_v51, %v95_v48  ;;  %v180_v53 = vpop.f32.mrb[2].mxu0 }
 0x221   :  { %v181_v54 = vadd.f32 %v180_v53, %v91_v47  ;;  %v182_v55 = vpop.f32.mrb[3].mxu0 }
 0x222   :  { %v219_v56 = vpack.c.bf16 %v179_v52, %v177_v50  ;;  %v183_v57 = vadd.f32 %v182_v55, %v95_v48 }
 0x224   :  { %200 = vst.msk [vmem:[%s326_s5] sm:$0xff] %vm199_vm3, %v219_v56  ;;  %v220_v58 = vpack.c.bf16 %v183_v57, %v181_v54 }
 0x226   :  { %201 = vst.msk [vmem:[%s326_s5 + $0x8] sm:$0xff] %vm199_vm3, %v220_v58 }

// kernel: _lambda_.13
= control target key start
LH: loop header
LB: loop body
LE: loop exit
PB: predicated region body
PF: predicated region fallthrough
CT: control target
= control target key end

     0   :  { %vm22_vm0 = vcmask 523264   ;;  %v189_v0 = vmov 0.0   ;;  %vm190_vm1 = vmmov 0   ;;  %vm143_vm2 = vcmask 519168   ;;  %s248_s1 = inlined_call_operand.vmem [shape: bf16[64,64], index: 1, kind: input, shape index: {}]   ;;  %s249_s0 = inlined_call_operand.vmem [shape: bf16[16,64], index: 0, kind: input, shape index: {}]   ;;  %s250_s3 = inlined_call_operand.vmem [shape: bf16[16,64], index: 3, kind: input, shape index: {}]   ;;  %s251_s2 = inlined_call_operand.vmem [shape: f32[1,64], index: 2, kind: input, shape index: {}]   ;;  %s252_s4 = inlined_call_operand.vmem [shape: bf16[16,64], index: 4, kind: output, shape index: {}]  }
   0x1   :  { %170 = vmatprep.subr.bf16.mxu0 %v189_v0  ;;  %v184_v1 = vld [vmem:[%s248_s1] sm:$0xff]   ;;  %178 = vmatprep.mubr.msk.bf16.mxu0 %vm190_vm1, %v189_v0  ;;  %23 = vst.msk [vmem:[#allocation2] sm:$0xff] %vm22_vm0, %v189_v0  ;;  %24 = vst.msk [vmem:[#allocation2 + $0x8] sm:$0xff] %vm22_vm0, %v189_v0  ;;  %v185_v2 = vld [vmem:[%s248_s1 + $0x8] sm:$0xff]  }
   0x2   :  { %171 = vmatpush3.bf16.msra.mxu0 %v184_v1  ;;  %v186_v3 = vld [vmem:[%s248_s1 + $0x10] sm:$0xff]   ;;  %v187_v4 = vld [vmem:[%s248_s1 + $0x18] sm:$0xff]   ;;  %v188_v5 = vld [vmem:[%s249_s0] sm:$0xff]  }
   0x3   :  { %172 = vmatprep.subr.bf16.mxu0 %v189_v0  ;;  %v162_v14 = vld [vmem:[%s250_s3] sm:$0xff]  }
   0x4   :  { %v156_v15 = vld [vmem:[%s251_s2] ss:$0 sm:$0xff]  ;;  %v163_v16 = vunpack.c.l.bf16 %v162_v14  ;;  %v164_v19 = vunpack.c.h.bf16 %v162_v14 }
   0x6   :  { %173 = vmatpush3.bf16.msra.mxu0 %v185_v2 }
   0x7   :  { %174 = vmatprep.subr.bf16.mxu0 %v189_v0 }
   0x8   :  { %v25_v6 = vld [vmem:[#allocation2] sm:$0xff]  ;;  %v26_v8 = vld [vmem:[#allocation2 + $0x8] sm:$0xff] }
   0xa   :  { %175 = vmatpush3.bf16.msra.mxu0 %v186_v3 }
   0xb   :  { %176 = vmatprep.subr.bf16.mxu0 %v189_v0 }
   0xe   :  { %177 = vmatpush3.bf16.msra.mxu0 %v187_v4 }
  0x11   :  { %179 = vmatmul.mubr.msk.bf16.vlgmr.msra.gmra.mrb[0].mxu0 %vm22_vm0, %v188_v5 }
  0xe4   :  { %v104_v7 = vpop.f32.mrb[0].mxu0 }
  0xe5   :  { %v111_v9 = vadd.f32 %v104_v7, %v25_v6  ;;  %v180_v10 = vpop.f32.mrb[1].mxu0 }
  0xe6   :  { %v107_v11 = vpop.f32.mrb[2].mxu0 }
  0xe7   :  { %113 = vst.msk [vmem:[#allocation2] sm:$0xff] %vm22_vm0, %v111_v9  ;;  %v112_v12 = vadd.f32 %v107_v11, %v26_v8  ;;  %v181_v13 = vpop.f32.mrb[3].mxu0 }
  0xe9   :  { %114 = vst.msk [vmem:[#allocation2 + $0x8] sm:$0xff] %vm22_vm0, %v112_v12 }
  0xee   :  { %v118_v17 = vld [vmem:[#allocation2] sm:$0xff] }
  0xef   :  { %v127_v18 = vadd.f32 %v156_v15, %v118_v17 }
  0xf0   :  { %v119_v20 = vld [vmem:[#allocation2 + $0x8] sm:$0xff] }
  0xf1   :  { %v133_v21 = vadd.f32 %v163_v16, %v127_v18  ;;  %v128_v22 = vadd.f32 %v156_v15, %v119_v20 }
  0xf3   :  { %v159_v23 = vpack.c.bf16 %v133_v21, %v133_v21  ;;  %v134_v24 = vadd.f32 %v164_v19, %v128_v22 }
  0xf5   :  { %144 = vst.msk [vmem:[%s252_s4] sm:$0xf] %vm143_vm2, %v159_v23  ;;  %v160_v25 = vpack.c.bf16 %v134_v24, %v134_v24 }
  0xf7   :  { %145 = vst.msk [vmem:[%s252_s4 + $0x4] sm:$0xf] %vm143_vm2, %v160_v25 }

// kernel: _lambda_.14
= control target key start
LH: loop header
LB: loop body
LE: loop exit
PB: predicated region body
PF: predicated region fallthrough
CT: control target
= control target key end

     0   :  { %vm29_vm0 = vcmask 523264   ;;  %v283_v23 = vmov 0   ;;  %v88_v42 = vlaneseq  ;;  %s362_s0 = inlined_call_operand.vmem [shape: bf16[16,64], index: 0, kind: input, shape index: {}]   ;;  %s363_s3 = inlined_call_operand.vmem [shape: bf16[64,256], index: 3, kind: input, shape index: {}]   ;;  %s364_s1 = inlined_call_operand.vmem [shape: f32[1,64], index: 1, kind: input, shape index: {}]   ;;  %s365_s2 = inlined_call_operand.vmem [shape: f32[1,64], index: 2, kind: input, shape index: {}]   ;;  %s366_s4 = inlined_call_operand.vmem [shape: f32[1,256], index: 4, kind: input, shape index: {}]   ;;  %s367_s5 = inlined_call_operand.vmem [shape: bf16[16,256], index: 5, kind: output, shape index: {}]  }
   0x1   :  { %v255_v0 = vld [vmem:[%s362_s0] sm:$0xff]   ;;  %v262_v17 = vld [vmem:[%s363_s3 + $0x14] ss:$8 sps:$4 sm:$0xff]   ;;  %v264_v18 = vld [vmem:[%s363_s3 + $0x10] ss:$8 sps:$4 sm:$0xff]   ;;  %174 = vmatprep.mubr.bf16.mxu0 %v283_v23 }
   0x2   :  { %v256_v1 = vunpack.c.l.bf16 %v255_v0  ;;  %v257_v2 = vunpack.c.h.bf16 %v255_v0  ;;  %v259_v15 = vld [vmem:[%s363_s3 + $0x4] ss:$8 sps:$4 sm:$0xff]   ;;  %v261_v16 = vld [vmem:[%s363_s3] ss:$8 sps:$4 sm:$0xff]   ;;  %v268_v21 = vld [vmem:[%s363_s3 + $0x34] ss:$8 sps:$4 sm:$0xff]  }
   0x3   :  { %142 = vmatprep.subr.bf16.mxu0 %v259_v15  ;;  %v265_v19 = vld [vmem:[%s363_s3 + $0x24] ss:$8 sps:$4 sm:$0xff]   ;;  %v267_v20 = vld [vmem:[%s363_s3 + $0x20] ss:$8 sps:$4 sm:$0xff]   ;;  %v270_v22 = vld [vmem:[%s363_s3 + $0x30] ss:$8 sps:$4 sm:$0xff]  }
   0x4   :  { %v30_v3 = vsel %vm29_vm0, %v256_v1, 0.0  ;;  %v33_v4 = vsel %vm29_vm0, %v257_v2, 0.0  ;;  %143 = vmatpush1.bf16.msra.mxu0 %v261_v16  ;;  %v239_v32 = vld [vmem:[%s364_s1] ss:$0 sm:$0xff]  ;;  %v89_v43 = vshrl.u32 %v88_v42, 7 }
   0x5   :  { %31 = vadd.xlane.f32.xlu0 %v30_v3  ;;  %144 = vmatprep.subr.bf16.mxu0 %v262_v17  ;;  %v240_v36 = vld [vmem:[%s365_s2] ss:$0 sm:$0xff] }
   0x6   :  { %v90_v44 = vsub.s32 0, %v89_v43  ;;  %v86_v45 = vld [vmem:[%s366_s4] sm:$0x3]  ;;  %v94_v46 = vsub.s32 1, %v89_v43 }
   0x8   :  { %145 = vmatpush1.bf16.msra.mxu0 %v264_v18  ;;  %v91_v47 = vrot.slane %v86_v45, %v90_v44  ;;  %v95_v48 = vrot.slane %v86_v45, %v94_v46 }
   0x9   :  { %34 = vadd.xlane.f32.xlu0 %v33_v4  ;;  %146 = vmatprep.subr.bf16.mxu0 %v265_v19 }
   0xc   :  { %147 = vmatpush1.bf16.msra.mxu0 %v267_v20 }
   0xd   :  { %148 = vmatprep.subr.bf16.mxu0 %v268_v21 }
  0x10   :  { %149 = vmatpush1.bf16.msra.mxu0 %v270_v22 }
  0x92   :  { %v32_v5 = vpop.xlane.xlu0 %31 }
  0x93   :  { %v37_v6 = vmul.f32 0.015625, %v32_v5 }
  0x95   :  { %v39_v7 = vsub.f32 %v256_v1, %v37_v6 }
  0x96   :  { %v35_v8 = vpop.xlane.xlu0 %34 }
  0x97   :  { %v38_v9 = vmul.f32 0.015625, %v35_v8  ;;  %v41_v10 = vmul.f32 %v39_v7, %v39_v7 }
  0x99   :  { %v40_v11 = vsub.f32 %v257_v2, %v38_v9  ;;  %v43_v12 = vsel %vm29_vm0, %v41_v10, 0.0 }
  0x9a   :  { %44 = vadd.xlane.f32.xlu1 %v43_v12 }
  0x9b   :  { %v42_v13 = vmul.f32 %v40_v11, %v40_v11 }
  0x9d   :  { %v46_v14 = vsel %vm29_vm0, %v42_v13, 0.0 }
  0x9e   :  { %47 = vadd.xlane.f32.xlu1 %v46_v14 }
 0x127   :  { %v45_v24 = vpop.xlane.xlu1 %44 }
 0x128   :  { %v49_v25 = vmul.f32 0.015625, %v45_v24 }
 0x12a   :  { %v51_v26 = vadd.f32 1e-05, %v49_v25 }
 0x12b   :  { %v48_v27 = vpop.xlane.xlu1 %47 }
 0x12c   :  { %271 = vrsqrt.f32 %v51_v26  ;;  %v50_v28 = vmul.f32 0.015625, %v48_v27 }
 0x12e   :  { %v52_v29 = vadd.f32 1e-05, %v50_v28 }
 0x130   :  { %273 = vrsqrt.f32 %v52_v29 }
 0x136   :  { %v272_v30 = vpop.eup %271 }
 0x137   :  { %v55_v31 = vmul.f32 %v272_v30, %v39_v7 }
 0x139   :  { %v64_v34 = vmul.f32 %v239_v32, %v55_v31 }
 0x13a   :  { %v274_v33 = vpop.eup %273 }
 0x13b   :  { %v56_v35 = vmul.f32 %v274_v33, %v40_v11  ;;  %v73_v38 = vadd.f32 %v240_v36, %v64_v34 }
 0x13d   :  { %v65_v37 = vmul.f32 %v239_v32, %v56_v35 }
 0x13f   :  { %v74_v39 = vadd.f32 %v240_v36, %v65_v37 }
 0x141   :  { %v75_v40 = vpack.c.bf16 %v74_v39, %v73_v38 }
 0x143   :  { %76 = vst.msk [vmem:[#allocation2] sm:$0xff] %vm29_vm0, %v75_v40 }
 0x14a   :  { %v77_v41 = vld [vmem:[#allocation2] sm:$0xff] }
 0x14b   :  { %249 = vmatmul.mubr.msk.bf16.vlgmr.msra.gmra.mrb[0].mxu0 %vm29_vm0, %v77_v41 }
 0x21e   :  { %v176_v49 = vpop.f32.mrb[0].mxu0 }
 0x21f   :  { %v177_v50 = vadd.f32 %v176_v49, %v91_v47  ;;  %v178_v51 = vpop.f32.mrb[1].mxu0 }
 0x220   :  { %v179_v52 = vadd.f32 %v178_v51, %v95_v48  ;;  %v180_v53 = vpop.f32.mrb[2].mxu0 }
 0x221   :  { %v189_v54 = vmul.f32 %v177_v50, %v177_v50  ;;  %v181_v55 = vadd.f32 %v180_v53, %v91_v47  ;;  %v182_v56 = vpop.f32.mrb[3].mxu0  ;;  %v185_v15 = vmul.f32 0.5, %v177_v50 }
 0x222   :  { %v190_v57 = vmul.f32 %v179_v52, %v179_v52  ;;  %v183_v58 = vadd.f32 %v182_v56, %v95_v48  ;;  %v186_v18 = vmul.f32 0.5, %v179_v52 }
 0x223   :  { %v193_v59 = vmul.f32 %v189_v54, %v177_v50  ;;  %v191_v60 = vmul.f32 %v181_v55, %v181_v55  ;;  %v187_v22 = vmul.f32 0.5, %v181_v55 }
 0x224   :  { %v194_v61 = vmul.f32 %v190_v57, %v179_v52  ;;  %v192_v62 = vmul.f32 %v183_v58, %v183_v58  ;;  %v188_v25 = vmul.f32 0.5, %v183_v58 }
 0x225   :  { %v197_v63 = vmul.f32 0.044715, %v193_v59  ;;  %v195_v0 = vmul.f32 %v191_v60, %v181_v55 }
 0x226   :  { %v198_v1 = vmul.f32 0.044715, %v194_v61  ;;  %v196_v2 = vmul.f32 %v192_v62, %v183_v58 }
 0x227   :  { %v201_v3 = vadd.f32 %v197_v63, %v177_v50  ;;  %v199_v4 = vmul.f32 0.044715, %v195_v0 }
 0x228   :  { %v202_v5 = vadd.f32 %v198_v1, %v179_v52  ;;  %v200_v6 = vmul.f32 0.044715, %v196_v2 }
 0x229   :  { %v205_v7 = vmul.f32 0.7978846, %v201_v3  ;;  %v203_v8 = vadd.f32 %v199_v4, %v181_v55 }
 0x22a   :  { %v206_v9 = vmul.f32 0.7978846, %v202_v5  ;;  %v204_v10 = vadd.f32 %v200_v6, %v183_v58 }
 0x22b   :  { %275 = vtanh.f32 %v205_v7  ;;  %v207_v11 = vmul.f32 0.7978846, %v203_v8 }
 0x22c   :  { %277 = vtanh.f32 %v206_v9  ;;  %v208_v12 = vmul.f32 0.7978846, %v204_v10 }
 0x22d   :  { %279 = vtanh.f32 %v207_v11 }
 0x22e   :  { %281 = vtanh.f32 %v208_v12 }
 0x235   :  { %v276_v13 = vpop.eup %275 }
 0x236   :  { %v278_v14 = vpop.eup %277  ;;  %v213_v16 = vadd.f32 1.0, %v276_v13 }
 0x237   :  { %v280_v17 = vpop.eup %279  ;;  %v214_v19 = vadd.f32 1.0, %v278_v14 }
 0x238   :  { %v282_v20 = vpop.eup %281  ;;  %v217_v21 = vmul.f32 %v213_v16, %v185_v15  ;;  %v215_v23 = vadd.f32 1.0, %v280_v17 }
 0x239   :  { %v218_v24 = vmul.f32 %v214_v19, %v186_v18  ;;  %v216_v26 = vadd.f32 1.0, %v282_v20 }
 0x23a   :  { %v219_v27 = vmul.f32 %v215_v23, %v187_v22 }
 0x23b   :  { %v252_v28 = vpack.c.bf16 %v218_v24, %v217_v21  ;;  %v220_v29 = vmul.f32 %v216_v26, %v188_v25 }
 0x23d   :  { %233 = vst [vmem:[%s367_s5] sm:$0xff] %v252_v28  ;;  %v253_v30 = vpack.c.bf16 %v220_v29, %v219_v27 }
 0x23f   :  { %234 = vst [vmem:[%s367_s5 + $0x8] sm:$0xff] %v253_v30 }

// kernel: _lambda_.12
= control target key start
LH: loop header
LB: loop body
LE: loop exit
PB: predicated region body
PF: predicated region fallthrough
CT: control target
= control target key end

     0   :  { %9 = vsyncpa [#allocation3], 0  ;;  %s1456_s0 = inlined_call_operand.vmem [shape: bf16[16,192], index: 0, kind: input, shape index: {}]   ;;  %s1457_s1 = inlined_call_operand.vmem [shape: bf16[16,64], index: 1, kind: output, shape index: {0}]   ;;  %s1458_s2 = inlined_call_operand.hbm [shape: bf16[2,4,8,16], index: 2, kind: output, shape index: {1}]   ;;  %s1459_s3 = inlined_call_operand.hbm [shape: bf16[2,4,8,16], index: 3, kind: output, shape index: {2}]  }
   0x1   :  { %11 = vsyncpa [#allocation3 + $0x1], 0 }
   0x2   :  { %12 = vsyncpa [#allocation5], 0 }
   0x3   :  { %14 = vsyncpa [#allocation5 + $0x1], 0  ;;  %s1171_s12 = smov 0   ;;  %s1173_s13 = smov 0  }
   0x4   :  { %s1175_s14 = smov 0   ;;  %s1177_s15 = smov 0  }
   0x5 LB: > { %s1192_s16 = sadd.s32 4294967295, %s1137_s15   ;;  %s871_s17 = sadd.s32 4294967294, %s1137_s15   ;;  %s1137_s15 = sphi %s1177_s15, %s1467_s15   ;;  %s1133_s14 = sphi %s1175_s14, %s1466_s14   ;;  %s1129_s13 = sphi %s1173_s13, %s1465_s13   ;;  %s1125_s12 = sphi %s1171_s12, %s1464_s12  }
   0x6   : > { %s1196_s18 = sadd.s32 1, %s1137_s15   ;;  %s79_s19 = sadd.s32 1, %s1133_s14 }
   0x7   : > { %s76_s20 = ssub.s32 %s1137_s15, %s1196_s18  ;;  %p89_p0 = scmp.ne.s32.totalorder %s1133_s14, %s1129_s13 }
   0x8   : > { %p77_p1 = scmp.eq.s32.totalorder %s76_s20, 0  ;;  %p90_p2 = scmp.eq.s32.totalorder %s1192_s16, 1 }
   0x9   : > { %p95_p3 = scmp.ne.s32.totalorder %s1129_s13, %s1125_s12  ;;  %p96_p4 = scmp.eq.s32.totalorder %s871_s17, 1 }
   0xa   : > { %s1207_s21 = scalar_select %p77_p1, %s1133_s14, %s79_s19  }
   0xb   : > { %p1209_p5 = por %p90_p2, %p89_p0  ;;  %p1213_p6 = por %p96_p4, %p95_p3 }
   0xc   : > { %p874_p7 = scmp.ge.s32.totalorder %s1137_s15, 1  ;;  %p148_p8 = scmp.lt.s32.totalorder %s1137_s15, 3 }
   0xe   : > { %p149_p9 = pnand %p874_p7, %p148_p8 }
   0xf   : > { %p181_p10 = scmp.lt.s32.totalorder (!%p149_p9), %s1192_s16, 1  ;;  %v1139_v0 = vmov (!%p149_p9), 0.0   ;;  %vm1140_vm0 = vmmov (!%p149_p9), 0   ;;  %s1141_s29 = smov (!%p149_p9), 64   ;;  %vm202_vm1 = vcmask (!%p149_p9), 130048   ;;  %v192_v5 = vlaneseq (!%p149_p9) }
  0x10   : > { %152 = sbr.rel (%p149_p9) target bundleno = 1588 (0x634), region = 24  ;;  %923 = vmatprep.subr.bf16.mxu0 (!%p149_p9), %v1139_v0  ;;  %925 = vmatprep.mubr.msk.bf16.mxu0 (!%p149_p9), %vm1140_vm0, %v1139_v0  ;;  %s1142_s30 = smov (!%p149_p9), 48   ;;  %vm250_vm3 = vcmask (!%p149_p9), 64512   ;;  %vm268_vm4 = vcmask (!%p149_p9), 1043456   ;;  %vm316_vm5 = vcmask (!%p149_p9), 125952  }
  0x11   : > { %929 = vmatprep.subr.bf16.mxu1 (!%p149_p9), %v1139_v0  ;;  %931 = vmatprep.mubr.msk.bf16.mxu1 (!%p149_p9), %vm1140_vm0, %v1139_v0  ;;  %v1245_v6 = vshrl.u32 (!%p149_p9), %v192_v5, 7  ;;  %v1247_v7 = vand.u32 (!%p149_p9), 127, %v192_v5  ;;  %s1143_s4 = smov (!%p149_p9), 80   ;;  %s1144_s5 = smov (!%p149_p9), 112  }
  0x12   : > { %s1145_s6 = smov (!%p149_p9), 32   ;;  %s1146_s7 = smov (!%p149_p9), 96  }
  0x13   : > { %vm196_vm2 = vcmp.le.s32.totalorder (!%p149_p9), %v1247_v7, %v1245_v6  ;;  %s1147_s8 = smov (!%p149_p9), 16   ;;  %s1332_s9 = sand.u32 (!%p149_p9), 1, %s1129_s13  }
  0x14   : > { %s875_s10 = sshll.u32 (!%p149_p9), %s1332_s9, 4  ;;  %s1460_s20 = sshll.u32 (!%p149_p9), %s1192_s16, 8 }
  0x15   : > { %s180_s11 = scalar_lea.vmem (!%p149_p9), [#allocation4], %s875_s10  ;;  %s1336_s17 = scalar_lea.vmem (!%p149_p9), [#allocation2], %s875_s10 }
  0x16   : > { %s753_s19 = sshll.u32 (!%p149_p9), %s180_s11, 4  ;;  %s1356_s27 = scalar_lea.hbm (!%p149_p9), %s1459_s3, %s1460_s20  ;;  %s1348_s19 = int_to_ptr.vmem [resolvable:$true] %s753_s19 }
  0x17   : > { %s1224_s24 = scalar_select %p181_p10, %s1192_s16, 1 }
  0x19   : > { %s904_s25 = sshll.u32 %s1224_s24, 3 }
  0x1a   : > { %s185_s28 = scalar_lea.vmem %s1456_s0, %s904_s25 }
  0x1b   : > { %v1233_v1 = vld [vmem:[%s185_s28] sm:$0xff]  ;;  %s721_s28 = scalar_lea.sflag [#allocation5], %s1332_s9 }
  0x1c   : > { %v880_v2 = vcombine.low %v1233_v1, %v1233_v1  ;;  %v1259_v19 = vcombine.high %v1233_v1, %v1233_v1 }
  0x1e   : > { %200 = vrot.lane.b32.xlu0 %v880_v2, %s1141_s29  ;;  %323 = vrot.lane.b32.xlu1 %v880_v2, %s1142_s30  ;;  %v270_v20 = vsel %vm268_vm4, %v1259_v19, 0 }
  0x1f   : > { %930 = vmatpush3.bf16.msra.mxu1 %v270_v20 }
  0x20   : > { %935 = vmatprep.subr.bf16.mxu1 %v1139_v0 }
  0x90   : > { %v201_v3 = vpop.permute.xlu0 %200  ;;  %v324_v21 = vpop.permute.xlu1 %323 }
  0x91   : > { %v207_v4 = vsel %vm202_vm1, %v201_v3, 0  ;;  %v329_v28 = vsel %vm202_vm1, %v324_v21, 0 }
  0x92   : > { %924 = vmatpush3.bf16.xpose.msra.mxu0 %v207_v4 }
  0x93   : > { %941 = vmatprep.subr.bf16.mxu0 %v1139_v0 }
  0x99   : > { %926 = vmatmul.mubr.msk.bf16.vlgmr.msra.gmra.mrb[0].mxu0 %vm202_vm1, %v1233_v1 }
  0x9a   : > { %943 = vmatprep.mubr.msk.bf16.mxu0 %vm1140_vm0, %v1139_v0 }
 0x16c   : > { %v243_v8 = vpop.f32.mrb[0].mxu0 }
 0x16d   : > { %v249_v9 = vsel %vm196_vm2, %v243_v8, -3.4028235e+38  ;;  %v927_v10 = vpop.f32.mrb[1].mxu0 }
 0x16e   : > { %v246_v11 = vpop.f32.mrb[2].mxu0  ;;  %v251_v12 = vsel %vm250_vm3, %v249_v9, -inf }
 0x16f   : > { %252 = vmax.xlane.f32.xlu0 %v251_v12  ;;  %v928_v13 = vpop.f32.mrb[3].mxu0 }
 0x185   : > { %567 = vrot.lane.b32.xlu0 %v880_v2, %s1143_s4 }
 0x1fc   : > { %v253_v14 = vpop.xlane.xlu0 %252 }
 0x1fd   : > { %v254_v15 = vsub.f32 %v249_v9, %v253_v14 }
 0x1ff   : > { %v255_v16 = vmul.f32 1.442695, %v254_v15 }
 0x200   : > { %v568_v33 = vpop.permute.xlu0 %567 }
 0x201   : > { %1027 = vpow2.f32 %v255_v16 }
 0x20b   : > { %v1028_v17 = vpop.eup %1027 }
 0x20c   : > { %v257_v18 = vsel %vm250_vm3, %v1028_v17, 0.0 }
 0x20d   : > { %258 = vadd.xlane.f32.xlu1 %v257_v18 }
 0x21e   : > { %321 = vrot.lane.b32.xlu1 %v880_v2, %s1144_s5 }
 0x222   : > { %446 = vrot.lane.b32.xlu1 %v880_v2, %s1145_s6 }
 0x226   : > { %444 = vrot.lane.b32.xlu1 %v880_v2, %s1146_s7 }
 0x22a   : > { %569 = vrot.lane.b32.xlu1 %v880_v2, %s1147_s8 }
 0x29a   : > { %v259_v22 = vpop.xlane.xlu1 %258 }
 0x29b   : > { %1029 = vrcp.f32 %v259_v22 }
 0x29e   : > { %v322_v23 = vpop.permute.xlu1 %321 }
 0x2a2   : > { %v447_v27 = vpop.permute.xlu1 %446 }
 0x2a3   : > { %v452_v30 = vsel %vm202_vm1, %v447_v27, 0  ;;  %v318_v27 = vrot.slane %v1233_v1, 4 }
 0x2a5   : > { %v1030_v24 = vpop.eup %1029  ;;  %320 = vst.msk [vmem:[%s180_s11] sm:$0xf] %vm316_vm5, %v318_v27 }
 0x2a6   : > { %v261_v25 = vmul.f32 %v1030_v24, %v1028_v17  ;;  %v445_v29 = vpop.permute.xlu1 %444 }
 0x2a8   : > { %v262_v26 = vpack.c.bf16 %v261_v25, %v261_v25 }
 0x2aa   : > { %932 = vmatmul.mubr.msk.bf16.vlgmr.msra.gmra.mrb[0].mxu1 %vm250_vm3, %v262_v26  ;;  %v570_v31 = vpop.permute.xlu1 %569 }
 0x2ab   : > { %936 = vmatpush3.bf16.xpose.msra.mxu1 %v329_v28  ;;  %937 = vmatprep.mubr.msk.bf16.mxu1 %vm1140_vm0, %v1139_v0  ;;  %v575_v32 = vsel %vm202_vm1, %v570_v31, 0 }
 0x2ac   : > { %947 = vmatprep.subr.bf16.mxu1 %v1139_v0 }
 0x2b2   : > { %938 = vmatmul.mubr.msk.bf16.vlgmr.msra.gmra.mrb[4].mxu1 %vm202_vm1, %v322_v23 }
 0x2b3   : > { %948 = vmatpush3.bf16.xpose.msra.mxu1 %v452_v30  ;;  %949 = vmatprep.mubr.msk.bf16.mxu1 %vm1140_vm0, %v1139_v0 }
 0x2b4   : > { %959 = vmatprep.subr.bf16.mxu1 %v1139_v0 }
 0x2ba   : > { %950 = vmatmul.mubr.msk.bf16.vlgmr.msra.gmra.mrb[8].mxu1 %vm202_vm1, %v445_v29 }
 0x2bb   : > { %960 = vmatpush3.bf16.xpose.msra.mxu1 %v575_v32  ;;  %961 = vmatprep.mubr.msk.bf16.mxu1 %vm1140_vm0, %v1139_v0 }
 0x2c2   : > { %962 = vmatmul.mubr.msk.bf16.vlgmr.msra.gmra.mrb[12].mxu1 %vm202_vm1, %v568_v33 }
 0x37d   : > { %v1283_v34 = vpop.f32.mrb[0].mxu1 }
 0x37e   : > { %v933_v35 = vpop.f32.mrb[1].mxu1 }
 0x37f   : > { %v309_v36 = vpop.f32.mrb[2].mxu1 }
 0x380   : > { %v934_v37 = vpop.f32.mrb[3].mxu1 }
 0x385   : > { %v365_v38 = vpop.f32.mrb[4].mxu1 }
 0x386   : > { %v371_v39 = vsel %vm196_vm2, %v365_v38, -3.4028235e+38  ;;  %v939_v40 = vpop.f32.mrb[5].mxu1 }
 0x387   : > { %v368_v41 = vpop.f32.mrb[6].mxu1  ;;  %v372_v42 = vsel %vm250_vm3, %v371_v39, -inf }
 0x388   : > { %373 = vmax.xlane.f32.xlu1 %v372_v42  ;;  %v940_v43 = vpop.f32.mrb[7].mxu1 }
 0x38d   : > { %v488_v44 = vpop.f32.mrb[8].mxu1 }
 0x38e   : > { %v494_v45 = vsel %vm196_vm2, %v488_v44, -3.4028235e+38  ;;  %v951_v46 = vpop.f32.mrb[9].mxu1 }
 0x38f   : > { %v491_v47 = vpop.f32.mrb[10].mxu1  ;;  %v495_v48 = vsel %vm250_vm3, %v494_v45, -inf }
 0x390   : > { %496 = vmax.xlane.f32.xlu0 %v495_v48  ;;  %v952_v49 = vpop.f32.mrb[11].mxu1 }
 0x395   : > { %v611_v50 = vpop.f32.mrb[12].mxu1 }
 0x396   : > { %v617_v51 = vsel %vm196_vm2, %v611_v50, -3.4028235e+38  ;;  %v963_v52 = vpop.f32.mrb[13].mxu1 }
 0x397   : > { %v614_v53 = vpop.f32.mrb[14].mxu1  ;;  %v618_v54 = vsel %vm250_vm3, %v617_v51, -inf }
 0x398   : > { %619 = vmax.xlane.f32.xlu1 %v618_v54  ;;  %v964_v55 = vpop.f32.mrb[15].mxu1 }
 0x3a6   : > { %384 = vrot.lane.b32.xlu0 %v1259_v19, %s1144_s5 }
 0x3a9   : > { %507 = vrot.lane.b32.xlu1 %v1259_v19, %s1146_s7 }
 0x3aa   : > { %313 = vrot.lane.b32.xlu0 %v1233_v1, %s1141_s29 }
 0x3ae   : > { %438 = vrot.lane.b32.xlu0 %v1233_v1, %s1144_s5  ;;  %s1148_s5 = smov [#allocation4]  }
 0x3b2   : > { %684 = vrot.lane.b32.xlu0 %v1233_v1, %s1143_s4 }
 0x415   : > { %v374_v56 = vpop.xlane.xlu1 %373 }
 0x416   : > { %v375_v57 = vsub.f32 %v371_v39, %v374_v56 }
 0x418   : > { %v376_v58 = vmul.f32 1.442695, %v375_v57 }
 0x41a   : > { %1031 = vpow2.f32 %v376_v58 }
 0x41d   : > { %v497_v59 = vpop.xlane.xlu0 %496 }
 0x41e   : > { %v498_v60 = vsub.f32 %v494_v45, %v497_v59 }
 0x420   : > { %v499_v61 = vmul.f32 1.442695, %v498_v60 }
 0x421   : > { %v385_v9 = vpop.permute.xlu0 %384 }
 0x422   : > { %1033 = vpow2.f32 %v499_v61  ;;  %v390_v10 = vsel %vm268_vm4, %v385_v9, 0 }
 0x423   : > { %942 = vmatpush3.bf16.msra.mxu0 %v390_v10 }
 0x424   : > { %v1032_v62 = vpop.eup %1031  ;;  %953 = vmatprep.subr.bf16.mxu0 %v1139_v0 }
 0x425   : > { %v620_v63 = vpop.xlane.xlu1 %619  ;;  %v378_v2 = vsel %vm250_vm3, %v1032_v62, 0.0  ;;  %v314_v29 = vpop.permute.xlu0 %313 }
 0x426   : > { %v621_v3 = vsub.f32 %v617_v51, %v620_v63  ;;  %379 = vadd.xlane.f32.xlu1 %v378_v2  ;;  %317 = vst.msk [vmem:[%s1336_s17] sm:$0xf] %vm316_vm5, %v314_v29 }
 0x428   : > { %v622_v4 = vmul.f32 1.442695, %v621_v3 }
 0x429   : > { %v508_v11 = vpop.permute.xlu1 %507  ;;  %v439_v30 = vpop.permute.xlu0 %438 }
 0x42a   : > { %1035 = vpow2.f32 %v622_v4  ;;  %v513_v17 = vsel %vm268_vm4, %v508_v11, 0  ;;  %v440_v32 = vrot.slane %v439_v30, 4 }
 0x42c   : > { %v1034_v5 = vpop.eup %1033  ;;  %887 = vst.msk [vmem:[%s180_s11 + $0x4] sm:$0xf] %vm316_vm5, %v440_v32 }
 0x42d   : > { %v501_v6 = vsel %vm250_vm3, %v1034_v5, 0.0  ;;  %v685_v35 = vpop.permute.xlu0 %684 }
 0x42e   : > { %502 = vadd.xlane.f32.xlu1 %v501_v6  ;;  %v686_v36 = vrot.slane %v685_v35, 4 }
 0x430   : > { %895 = vst.msk [vmem:[%s180_s11 + $0xc] sm:$0xf] %vm316_vm5, %v686_v36 }
 0x434   : > { %v1036_v7 = vpop.eup %1035 }
 0x435   : > { %v624_v8 = vsel %vm250_vm3, %v1036_v7, 0.0 }
 0x436   : > { %625 = vadd.xlane.f32.xlu1 %v624_v8 }
 0x447   : > { %630 = vrot.lane.b32.xlu1 %v1259_v19, %s1143_s4  ;;  %s1043_s4 = scalar_lea.vmem %s1348_s19, 256 }
 0x448   : > { %p1044_p11 = scmp.ne.s32.totalorder %s1348_s19, %s1043_s4 }
 0x44a   : > { %p1045_p12 = pnand %p1044_p11, %p1209_p5 }
 0x44b   : > { %433 = vrot.lane.b32.xlu1 %v1233_v1, %s1142_s30 }
 0x44c   : > { %p1046_p13 = pneg %p1045_p12 }
 0x44f   : > { %561 = vrot.lane.b32.xlu1 %v1233_v1, %s1146_s7  ;;  %s1047_s7 = sshll.u32 %s1148_s5, 4  ;;  %s1048_s7 = int_to_ptr.vmem [resolvable:$false] %s1047_s7 }
 0x450   : > { %s1049_s10 = scalar_lea.vmem %s1048_s7, 512  ;;  %p1050_p0 = scmp.lt.s32.totalorder %s1348_s19, %s1048_s7 }
 0x451   : > { %p1051_p1 = scmp.lt.s32.totalorder %s1049_s10, %s1043_s4 }
 0x453   : > { %556 = vrot.lane.b32.xlu1 %v1233_v1, %s1145_s6  ;;  %p1052_p2 = por %p1051_p1, %p1050_p0 }
 0x455   : > { %p1053_p3 = pnand %p1052_p2, %p1046_p13 }
 0x4b3   : > { %v380_v12 = vpop.xlane.xlu1 %379 }
 0x4b4   : > { %1037 = vrcp.f32 %v380_v12 }
 0x4bb   : > { %v503_v13 = vpop.xlane.xlu1 %502 }
 0x4bc   : > { %1039 = vrcp.f32 %v503_v13 }
 0x4be   : > { %v1038_v14 = vpop.eup %1037 }
 0x4bf   : > { %v382_v15 = vmul.f32 %v1038_v14, %v1032_v62 }
 0x4c1   : > { %v383_v16 = vpack.c.bf16 %v382_v15, %v382_v15 }
 0x4c3   : > { %v626_v18 = vpop.xlane.xlu1 %625  ;;  %944 = vmatmul.mubr.msk.bf16.vlgmr.msra.gmra.mrb[4].mxu0 %vm250_vm3, %v383_v16 }
 0x4c4   : > { %1041 = vrcp.f32 %v626_v18  ;;  %954 = vmatpush3.bf16.msra.mxu0 %v513_v17  ;;  %955 = vmatprep.mubr.msk.bf16.mxu0 %vm1140_vm0, %v1139_v0 }
 0x4c5   : > { %965 = vmatprep.subr.bf16.mxu0 %v1139_v0 }
 0x4c6   : > { %v1040_v19 = vpop.eup %1039 }
 0x4c7   : > { %v505_v20 = vmul.f32 %v1040_v19, %v1034_v5  ;;  %v631_v21 = vpop.permute.xlu1 %630 }
 0x4c8   : > { %v636_v22 = vsel %vm268_vm4, %v631_v21, 0 }
 0x4c9   : > { %v506_v23 = vpack.c.bf16 %v505_v20, %v505_v20 }
 0x4cb   : > { %956 = vmatmul.mubr.msk.bf16.vlgmr.msra.gmra.mrb[8].mxu0 %vm250_vm3, %v506_v23  ;;  %v434_v28 = vpop.permute.xlu1 %433 }
 0x4cc   : > { %966 = vmatpush3.bf16.msra.mxu0 %v636_v22  ;;  %967 = vmatprep.mubr.msk.bf16.mxu0 %vm1140_vm0, %v1139_v0  ;;  %886 = vst.msk [vmem:[%s1336_s17 + $0x4] sm:$0xf] %vm316_vm5, %v434_v28 }
 0x4ce   : > { %v1042_v24 = vpop.eup %1041 }
 0x4cf   : > { %v628_v25 = vmul.f32 %v1042_v24, %v1036_v7  ;;  %v562_v0 = vpop.permute.xlu1 %561 }
 0x4d0   : > { %v563_v31 = vrot.slane %v562_v0, 4 }
 0x4d1   : > { %v629_v26 = vpack.c.bf16 %v628_v25, %v628_v25 }
 0x4d2   : > { %891 = vst.msk [vmem:[%s180_s11 + $0x8] sm:$0xf] %vm316_vm5, %v563_v31 }
 0x4d3   : > { %968 = vmatmul.mubr.msk.bf16.vlgmr.msra.gmra.mrb[12].mxu0 %vm250_vm3, %v629_v26  ;;  %v557_v33 = vpop.permute.xlu1 %556 }
 0x4d4   : > { %890 = vst.msk [vmem:[%s1336_s17 + $0x8] sm:$0xf] %vm316_vm5, %v557_v33 }
 0x596   : > { %v426_v37 = vpop.f32.mrb[4].mxu0 }
 0x597   : > { %v432_v38 = vpack.c.bf16 %v426_v37, %v426_v37  ;;  %v945_v39 = vpop.f32.mrb[5].mxu0 }
 0x598   : > { %v429_v40 = vpop.f32.mrb[6].mxu0 }
 0x599   : > { %691 = vrot.lane.b32.xlu1 %v432_v38, %s1147_s8  ;;  %v946_v41 = vpop.f32.mrb[7].mxu0 }
 0x59e   : > { %v549_v42 = vpop.f32.mrb[8].mxu0 }
 0x59f   : > { %v555_v43 = vpack.c.bf16 %v549_v42, %v549_v42  ;;  %v957_v44 = vpop.f32.mrb[9].mxu0 }
 0x5a0   : > { %1056 = shalt.err (!%p1053_p3)
}
 0x5a1   : > { %s1057_s11 = scalar_lea.hbm %s1356_s27, 256  ;;  %s1061_s5 = scalar_lea.hbm %s1459_s3, 512 }
 0x5a2   : > { %p1058_p4 = scmp.ne.s32.totalorder %s1356_s27, %s1057_s11  ;;  %p1062_p9 = scmp.lt.u32.totalorder %s1356_s27, %s1459_s3 }
 0x5a3   : > { %p1063_p10 = scmp.lt.u32.totalorder %s1061_s5, %s1057_s11  ;;  %p1065_p12 = scmp.lt.u32.totalorder %s1057_s11, %s1356_s27 }
 0x5a4   : > { %p1059_p7 = pnand %p1058_p4, %p1209_p5 }
 0x5a5   : > { %p1064_p11 = por %p1063_p10, %p1062_p9 }
 0x5a6   : > { %p1060_p8 = pneg %p1059_p7 }
 0x5a7   : > { %p1066_p13 = por %p1065_p12, %p1064_p11 }
 0x5a9   : > { %p1067_p0 = pnand %p1066_p13, %p1060_p8 }
 0x5ab   : > { %1070 = shalt.err (!%p1067_p0)
}
 0x5ac   : > { %s1149_s4 = smov 4   ;;  %v552_v45 = vpop.f32.mrb[10].mxu0  ;;  %694 = vrot.lane.b32.xlu0 %v555_v43, %s1145_s6  ;;  %s737_s20 = sshll.u32 %s1336_s17, 4  ;;  %v312_v54 = vpack.c.bf16 %v1283_v34, %v1283_v34  ;;  %vm702_vm6 = vcmask 261120   ;;  %vm705_vm7 = vcmask 392192   ;;  %s1390_s20 = int_to_ptr.vmem [resolvable:$true] %s737_s20 }
 0x5ad   : > { %972 = dma.vmem_to_hbm [thread:$0]  (%p1209_p5), %s1348_s19, 256, %s1356_s27, %s721_s28, %s1141_s29, %s1141_s29, %s1149_s4   ;;  %v958_v46 = vpop.f32.mrb[11].mxu0 }
 0x5ae   : > { %v672_v47 = vpop.f32.mrb[12].mxu0  ;;  %s1463_s19 = sshll.u32 %s1192_s16, 8  ;;  %s879_s28 = sshll.u32 %s1224_s24, 2 }
 0x5af   : > { %v678_v48 = vpack.c.bf16 %v672_v47, %v672_v47  ;;  %v969_v49 = vpop.f32.mrb[13].mxu0  ;;  %s1071_s16 = scalar_lea.vmem %s1390_s20, 256  ;;  %s1150_s10 = smov [#allocation2]  }
 0x5b0   : > { %679 = vrot.lane.b32.xlu0 %v1233_v1, %s1147_s8  ;;  %v675_v50 = vpop.f32.mrb[14].mxu0  ;;  %s1397_s8 = scalar_lea.hbm %s1458_s2, %s1463_s19  ;;  %p1072_p1 = scmp.ne.s32.totalorder %s1390_s20, %s1071_s16 }
 0x5b1   : > { %697 = vrot.lane.b32.xlu1 %v678_v48, %s1142_s30  ;;  %v970_v51 = vpop.f32.mrb[15].mxu0  ;;  %s716_s30 = scalar_lea.sflag [#allocation3], %s1332_s9  ;;  %s1075_s11 = sshll.u32 %s1150_s10, 4  ;;  %s1076_s11 = int_to_ptr.vmem [resolvable:$false] %s1075_s11 }
 0x5b2   : > { %p1073_p2 = pnand %p1072_p1, %p1209_p5  ;;  %s1077_s25 = scalar_lea.vmem %s1076_s11, 512 }
 0x5b3   : > { %p1078_p4 = scmp.lt.s32.totalorder %s1390_s20, %s1076_s11  ;;  %p1079_p7 = scmp.lt.s32.totalorder %s1077_s25, %s1071_s16 }
 0x5b4   : > { %p1074_p3 = pneg %p1073_p2 }
 0x5b5   : > { %p1080_p8 = por %p1079_p7, %p1078_p4 }
 0x5b7   : > { %p1081_p9 = pnand %p1080_p8, %p1074_p3 }
 0x60b   : > { %v692_v1 = vpop.permute.xlu1 %691 }
 0x61e   : > { %v695_v52 = vpop.permute.xlu0 %694 }
 0x622   : > { %v680_v53 = vpop.permute.xlu0 %679 }
 0x623   : > { %894 = vst.msk [vmem:[%s1336_s17 + $0xc] sm:$0xf] %vm316_vm5, %v680_v53 }
 0x624   : > { %1084 = shalt.err (!%p1081_p9)
}
 0x625   : > { %s1085_s17 = scalar_lea.hbm %s1397_s8, 256  ;;  %s1089_s7 = scalar_lea.hbm %s1458_s2, 512 }
 0x626   : > { %p1086_p10 = scmp.ne.s32.totalorder %s1397_s8, %s1085_s17  ;;  %p1090_p13 = scmp.lt.u32.totalorder %s1397_s8, %s1458_s2 }
 0x627   : > { %p1091_p0 = scmp.lt.u32.totalorder %s1089_s7, %s1085_s17  ;;  %p1093_p2 = scmp.lt.u32.totalorder %s1085_s17, %s1397_s8 }
 0x628   : > { %p1087_p11 = pnand %p1086_p10, %p1209_p5 }
 0x629   : > { %p1092_p1 = por %p1091_p0, %p1090_p13 }
 0x62a   : > { %p1088_p12 = pneg %p1087_p11 }
 0x62b   : > { %p1094_p3 = por %p1093_p2, %p1092_p1 }
 0x62d   : > { %p1095_p4 = pnand %p1094_p3, %p1088_p12 }
 0x62f   : > { %1098 = shalt.err (!%p1095_p4)
}
 0x630   : > { %971 = dma.vmem_to_hbm [thread:$0]  (%p1209_p5), %s1390_s20, 256, %s1397_s8, %s716_s30, %s1141_s29, %s1141_s29, %s1149_s4   ;;  %v701_v34 = vsel %vm202_vm1, %v312_v54, %v692_v1  ;;  %vm709_vm8 = vcmask 519168   ;;  %v698_v56 = vpop.permute.xlu1 %697 }
 0x631   : > { %s189_s10 = scalar_lea.vmem %s1457_s1, %s879_s28  ;;  %v704_v55 = vsel %vm702_vm6, %v701_v34, %v695_v52 }
 0x632   : > { %v707_v57 = vsel %vm705_vm7, %v704_v55, %v698_v56 }
 0x633   : > { %710 = vst.msk [vmem:[%s189_s10] sm:$0xf] %vm709_vm8, %v707_v57 }
 0x634 PF: > { %p982_p7 = scmp.ge.s32.totalorder %s1137_s15, 2  ;;  %s775_s22 = sand.u32 1, %s1125_s12  }
 0x635   : > { %s776_s24 = scalar_lea.sflag [#allocation3], %s775_s22 }
 0x636   : > { %p976_p5 = pnand %p982_p7, %p1213_p6 }
 0x638   : > { %1116 = dma.done.wait (!%p976_p5), %s776_s24, 256  }
 0x639   : > { %1118 = vsyncadd (!%p976_p5), %s776_s24, 4294967040  ;;  %s785_s29 = scalar_lea.sflag [#allocation5], %s775_s22 }
 0x63a   : > { %1120 = dma.done.wait (!%p976_p5), %s785_s29, 256  }
 0x63b   : > { %1122 = vsyncadd (!%p976_p5), %s785_s29, 4294967040  ;;  %p17_p8 = scmp.ge.s32.totalorder %s1196_s18, 4   ;;  %s1464_s12 = smov %s1129_s13 }
 0x63c   : > { %s1465_s13 = smov %s1133_s14  ;;  %s1466_s14 = smov %s1207_s21 }
 0x63d   : > { %s1467_s15 = smov %s1196_s18  ;;  %19 = sbr.rel (!%p17_p8) target bundleno = 5 (0x5), region = 94 }
 0x644   :  { %790 = vsyncpa [#allocation3], 1 }
 0x645   :  { %792 = vsyncpa [#allocation3 + $0x1], 1 }
 0x646   :  { %793 = vsyncpa [#allocation5], 1 }
 0x647   :  { %795 = vsyncpa [#allocation5 + $0x1], 1 }

// kernel: _lambda_.15
= control target key start
LH: loop header
LB: loop body
LE: loop exit
PB: predicated region body
PF: predicated region fallthrough
CT: control target
= control target key end

     0   :  { %vm22_vm0 = vcmask 523264   ;;  %v317_v18 = vmov 0.0   ;;  %vm241_vm1 = vcmask 519168   ;;  %s413_s1 = inlined_call_operand.vmem [shape: bf16[256,64], index: 1, kind: input, shape index: {}]   ;;  %s414_s0 = inlined_call_operand.vmem [shape: bf16[16,256], index: 0, kind: input, shape index: {}]   ;;  %s415_s3 = inlined_call_operand.vmem [shape: bf16[16,64], index: 3, kind: input, shape index: {}]   ;;  %s416_s2 = inlined_call_operand.vmem [shape: f32[1,64], index: 2, kind: input, shape index: {}]   ;;  %s417_s4 = inlined_call_operand.vmem [shape: bf16[16,64], index: 4, kind: output, shape index: {}]  }
   0x1   :  { %v298_v0 = vld [vmem:[%s413_s1 + $0x40] sm:$0xff]   ;;  %v300_v2 = vld [vmem:[%s413_s1 + $0x48] sm:$0xff]   ;;  %v302_v4 = vld [vmem:[%s413_s1 + $0x50] sm:$0xff]   ;;  %23 = vst.msk [vmem:[#allocation2] sm:$0xff] %vm22_vm0, %v317_v18 }
   0x2   :  { %v299_v1 = vld [vmem:[%s413_s1] sm:$0xff]   ;;  %275 = vmatprep.subr.bf16.mxu0 %v298_v0  ;;  %v301_v3 = vld [vmem:[%s413_s1 + $0x8] sm:$0xff]   ;;  %v303_v5 = vld [vmem:[%s413_s1 + $0x10] sm:$0xff]   ;;  %24 = vst.msk [vmem:[#allocation2 + $0x8] sm:$0xff] %vm22_vm0, %v317_v18 }
   0x3   :  { %276 = vmatpush3.bf16.msra.mxu0 %v299_v1  ;;  %v304_v6 = vld [vmem:[%s413_s1 + $0x58] sm:$0xff]   ;;  %v306_v8 = vld [vmem:[%s413_s1 + $0x60] sm:$0xff]   ;;  %v308_v10 = vld [vmem:[%s413_s1 + $0x68] sm:$0xff]  }
   0x4   :  { %277 = vmatprep.subr.bf16.mxu0 %v300_v2  ;;  %v305_v7 = vld [vmem:[%s413_s1 + $0x18] sm:$0xff]   ;;  %v307_v9 = vld [vmem:[%s413_s1 + $0x20] sm:$0xff]   ;;  %v309_v12 = vld [vmem:[%s413_s1 + $0x28] sm:$0xff]  }
   0x5   :  { %v316_v11 = vld [vmem:[%s414_s0 + $0x4] ss:$8 sps:$4 sm:$0xff]   ;;  %v310_v13 = vld [vmem:[%s413_s1 + $0x70] sm:$0xff]   ;;  %v312_v15 = vld [vmem:[%s413_s1 + $0x78] sm:$0xff]  }
   0x6   :  { %199 = vmatprep.mubr.bf16.mxu0 %v316_v11  ;;  %v311_v14 = vld [vmem:[%s413_s1 + $0x30] sm:$0xff]   ;;  %v313_v16 = vld [vmem:[%s413_s1 + $0x38] sm:$0xff]   ;;  %v314_v17 = vld [vmem:[%s414_s0] ss:$8 sps:$4 sm:$0xff]  }
   0x7   :  { %278 = vmatpush3.bf16.msra.mxu0 %v301_v3  ;;  %v272_v29 = vld [vmem:[%s415_s3] sm:$0xff]  }
   0x8   :  { %279 = vmatprep.subr.bf16.mxu0 %v302_v4  ;;  %v25_v20 = vld [vmem:[#allocation2] sm:$0xff]  ;;  %v273_v31 = vunpack.c.l.bf16 %v272_v29  ;;  %v274_v34 = vunpack.c.h.bf16 %v272_v29 }
   0x9   :  { %v26_v24 = vld [vmem:[#allocation2 + $0x8] sm:$0xff]  ;;  %v266_v30 = vld [vmem:[%s416_s2] ss:$0 sm:$0xff] }
   0xb   :  { %280 = vmatpush3.bf16.msra.mxu0 %v303_v5 }
   0xc   :  { %281 = vmatprep.subr.bf16.mxu0 %v304_v6 }
   0xf   :  { %282 = vmatpush3.bf16.msra.mxu0 %v305_v7 }
  0x10   :  { %283 = vmatprep.subr.bf16.mxu0 %v306_v8 }
  0x13   :  { %284 = vmatpush3.bf16.msra.mxu0 %v307_v9 }
  0x14   :  { %285 = vmatprep.subr.bf16.mxu0 %v308_v10 }
  0x17   :  { %286 = vmatpush3.bf16.msra.mxu0 %v309_v12 }
  0x18   :  { %287 = vmatprep.subr.bf16.mxu0 %v310_v13 }
  0x1b   :  { %288 = vmatpush3.bf16.msra.mxu0 %v311_v14 }
  0x1c   :  { %289 = vmatprep.subr.bf16.mxu0 %v312_v15 }
  0x1f   :  { %290 = vmatpush3.bf16.msra.mxu0 %v313_v16 }
  0x22   :  { %200 = vmatmul.mubr.bf16.vlgmr.msra.gmra.mrb[0].mxu0 %v314_v17 }
  0xf5   :  { %v291_v19 = vpop.f32.mrb[0].mxu0 }
  0xf6   :  { %v292_v21 = vpop.f32.mrb[1].mxu0 }
  0xf7   :  { %v293_v22 = vadd.f32 %v292_v21, %v291_v19  ;;  %v294_v23 = vpop.f32.mrb[2].mxu0 }
  0xf8   :  { %v295_v25 = vpop.f32.mrb[3].mxu0 }
  0xf9   :  { %v208_v26 = vadd.f32 %v293_v22, %v25_v20  ;;  %v296_v27 = vadd.f32 %v295_v25, %v294_v23 }
  0xfb   :  { %211 = vst.msk [vmem:[#allocation2] sm:$0xff] %vm22_vm0, %v208_v26  ;;  %v209_v28 = vadd.f32 %v296_v27, %v26_v24 }
  0xfd   :  { %212 = vst.msk [vmem:[#allocation2 + $0x8] sm:$0xff] %vm22_vm0, %v209_v28 }
 0x102   :  { %v216_v32 = vld [vmem:[#allocation2] sm:$0xff] }
 0x103   :  { %v225_v33 = vadd.f32 %v266_v30, %v216_v32 }
 0x104   :  { %v217_v35 = vld [vmem:[#allocation2 + $0x8] sm:$0xff] }
 0x105   :  { %v231_v36 = vadd.f32 %v273_v31, %v225_v33  ;;  %v226_v37 = vadd.f32 %v266_v30, %v217_v35 }
 0x107   :  { %v269_v38 = vpack.c.bf16 %v231_v36, %v231_v36  ;;  %v232_v39 = vadd.f32 %v274_v34, %v226_v37 }
 0x109   :  { %242 = vst.msk [vmem:[%s417_s4] sm:$0xf] %vm241_vm1, %v269_v38  ;;  %v270_v40 = vpack.c.bf16 %v232_v39, %v232_v39 }
 0x10b   :  { %243 = vst.msk [vmem:[%s417_s4 + $0x4] sm:$0xf] %vm241_vm1, %v270_v40 }

// kernel: _lambda_.21
= control target key start
LH: loop header
LB: loop body
LE: loop exit
PB: predicated region body
PF: predicated region fallthrough
CT: control target
= control target key end

     0   :  { %vm27_vm0 = vcmask 523264   ;;  %s305_s0 = inlined_call_operand.vmem [shape: bf16[16,64], index: 0, kind: input, shape index: {}]   ;;  %s306_s1 = inlined_call_operand.vmem [shape: f32[1,64], index: 1, kind: input, shape index: {}]   ;;  %s307_s2 = inlined_call_operand.vmem [shape: f32[1,64], index: 2, kind: input, shape index: {}]   ;;  %s308_s3 = inlined_call_operand.vmem [shape: bf16[64,128], index: 3, kind: input, shape index: {}]   ;;  %s309_s4 = inlined_call_operand.hbm [shape: f32[16,128], index: 4, kind: output, shape index: {}]  }
   0x1   :  { %v179_v0 = vld [vmem:[%s305_s0] sm:$0xff]  }
   0x2   :  { %v180_v1 = vunpack.c.l.bf16 %v179_v0  ;;  %v181_v2 = vunpack.c.h.bf16 %v179_v0 }
   0x4   :  { %v28_v3 = vsel %vm27_vm0, %v180_v1, 0.0 }
   0x5   :  { %9 = vsyncpa [#allocation4], 0  ;;  %29 = vadd.xlane.f32.xlu0 %v28_v3  ;;  %v31_v4 = vsel %vm27_vm0, %v181_v2, 0.0  ;;  %v204_v15 = vld [vmem:[%s308_s3] sm:$0xff]   ;;  %v236_v16 = vmov 0.0   ;;  %v205_v17 = vld [vmem:[%s308_s3 + $0x8] sm:$0xff]  }
   0x6   :  { %187 = vmatprep.subr.bf16.mxu0 %v236_v16  ;;  %v206_v18 = vld [vmem:[%s308_s3 + $0x10] sm:$0xff]   ;;  %v207_v19 = vld [vmem:[%s308_s3 + $0x18] sm:$0xff]   ;;  %vm237_vm1 = vmmov 0   ;;  %v171_v28 = vld [vmem:[%s306_s1] ss:$0 sm:$0xff]  ;;  %s238_s27 = smov [#allocation3]  }
   0x7   :  { %188 = vmatpush3.bf16.msra.mxu0 %v204_v15  ;;  %195 = vmatprep.mubr.msk.bf16.mxu0 %vm237_vm1, %v236_v16  ;;  %v172_v32 = vld [vmem:[%s307_s2] ss:$0 sm:$0xff]  ;;  %s160_s28 = sshll.u32 %s238_s27, 4  ;;  %s161_s28 = int_to_ptr.vmem [resolvable:$true] %s160_s28 }
   0x8   :  { %189 = vmatprep.subr.bf16.mxu0 %v236_v16  ;;  %s212_s1 = scalar_lea.vmem %s161_s28, 256  ;;  %p217_p1 = scmp.lt.s32.totalorder %s161_s28, %s161_s28 }
   0x9   :  { %32 = vadd.xlane.f32.xlu0 %v31_v4  ;;  %p213_p0 = scmp.ne.s32.totalorder %s161_s28, %s212_s1  ;;  %p218_p2 = scmp.lt.s32.totalorder %s212_s1, %s212_s1 }
   0xb   :  { %190 = vmatpush3.bf16.msra.mxu0 %v205_v17  ;;  %p219_p3 = por %p218_p2, %p217_p1 }
   0xc   :  { %191 = vmatprep.subr.bf16.mxu0 %v236_v16 }
   0xd   :  { %p220_p4 = pnand %p219_p3, %p213_p0 }
   0xf   :  { %192 = vmatpush3.bf16.msra.mxu0 %v206_v18 }
  0x10   :  { %193 = vmatprep.subr.bf16.mxu0 %v236_v16 }
  0x13   :  { %194 = vmatpush3.bf16.msra.mxu0 %v207_v19 }
  0x92   :  { %v30_v5 = vpop.xlane.xlu0 %29 }
  0x93   :  { %v35_v6 = vmul.f32 0.015625, %v30_v5 }
  0x95   :  { %v37_v7 = vsub.f32 %v180_v1, %v35_v6 }
  0x96   :  { %v33_v8 = vpop.xlane.xlu0 %32 }
  0x97   :  { %v36_v9 = vmul.f32 0.015625, %v33_v8  ;;  %v39_v10 = vmul.f32 %v37_v7, %v37_v7 }
  0x99   :  { %v38_v11 = vsub.f32 %v181_v2, %v36_v9  ;;  %v41_v12 = vsel %vm27_vm0, %v39_v10, 0.0 }
  0x9a   :  { %42 = vadd.xlane.f32.xlu1 %v41_v12 }
  0x9b   :  { %v40_v13 = vmul.f32 %v38_v11, %v38_v11 }
  0x9d   :  { %v44_v14 = vsel %vm27_vm0, %v40_v13, 0.0 }
  0x9e   :  { %45 = vadd.xlane.f32.xlu1 %v44_v14 }
 0x127   :  { %v43_v20 = vpop.xlane.xlu1 %42 }
 0x128   :  { %v47_v21 = vmul.f32 0.015625, %v43_v20 }
 0x12a   :  { %v49_v22 = vadd.f32 1e-05, %v47_v21 }
 0x12b   :  { %v46_v23 = vpop.xlane.xlu1 %45 }
 0x12c   :  { %208 = vrsqrt.f32 %v49_v22  ;;  %v48_v24 = vmul.f32 0.015625, %v46_v23 }
 0x12e   :  { %v50_v25 = vadd.f32 1e-05, %v48_v24 }
 0x130   :  { %210 = vrsqrt.f32 %v50_v25 }
 0x136   :  { %v209_v26 = vpop.eup %208 }
 0x137   :  { %v53_v27 = vmul.f32 %v209_v26, %v37_v7 }
 0x139   :  { %v62_v30 = vmul.f32 %v171_v28, %v53_v27 }
 0x13a   :  { %v211_v29 = vpop.eup %210 }
 0x13b   :  { %v54_v31 = vmul.f32 %v211_v29, %v38_v11  ;;  %v71_v34 = vadd.f32 %v172_v32, %v62_v30 }
 0x13d   :  { %v63_v33 = vmul.f32 %v171_v28, %v54_v31 }
 0x13f   :  { %v72_v35 = vadd.f32 %v172_v32, %v63_v33 }
 0x141   :  { %v73_v36 = vpack.c.bf16 %v72_v35, %v71_v34 }
 0x143   :  { %74 = vst.msk [vmem:[#allocation2] sm:$0xff] %vm27_vm0, %v73_v36 }
 0x14a   :  { %v75_v37 = vld [vmem:[#allocation2] sm:$0xff] }
 0x14b   :  { %196 = vmatmul.mubr.msk.bf16.vlgmr.msra.gmra.mrb[0].mxu0 %vm27_vm0, %v75_v37 }
 0x21e   :  { %v146_v38 = vpop.f32.mrb[0].mxu0 }
 0x21f   :  { %153 = vst [vmem:[#allocation3] sm:$0xff] %v146_v38  ;;  %v197_v39 = vpop.f32.mrb[1].mxu0 }
 0x220   :  { %v149_v40 = vpop.f32.mrb[2].mxu0 }
 0x221   :  { %154 = vst [vmem:[#allocation3 + $0x8] sm:$0xff] %v149_v40  ;;  %v198_v41 = vpop.f32.mrb[3].mxu0 }
 0x222   :  { %223 = shalt.err (!%p220_p4)
}
 0x223   :  { %s224_s30 = scalar_lea.hbm %s309_s4, 256 }
 0x224   :  { %p225_p5 = scmp.ne.s32.totalorder %s309_s4, %s224_s30  ;;  %p228_p6 = scmp.lt.u32.totalorder %s224_s30, %s309_s4 }
 0x226   :  { %p230_p7 = pnand %p228_p6, %p225_p5 }
 0x228   :  { %233 = shalt.err (!%p230_p7)
}
 0x229   :  { %s239_s9 = smov 128   ;;  %s240_s10 = smov 8  }
 0x22a   :  { %166 = dma.vmem_to_hbm [thread:$0]  %s161_s28, 256, %s309_s4, [#allocation4], %s239_s9, %s239_s9, %s240_s10  }
 0x22b   :  { %234 = dma.done.wait [#allocation4], 256  }
 0x22c   :  { %235 = vsyncadd [#allocation4], 4294967040 }
 0x22d   :  { %170 = vsyncpa [#allocation4], 1 }

</bundles_post_ra>
